<compile_context>
chip_gen: v5e
topology: v5e:2x2
jax: 0.10.0
libtpu: 0.0.40
codegen_flags: <defaults>
</compile_context>

<pallas_src>
import functools

import jax
import jax.numpy as jnp
from jax.experimental import pallas as pl
from jax.experimental.pallas import tpu as pltpu


# ----------------------------------------------------------------------------
# Tiling helper
# ----------------------------------------------------------------------------
def _batch_tile_and_pad(batch):
    """Return (batch_tile, padded_batch).

    * batch a multiple of a large tile -> use it directly (no padding).
    * large non-multiple batch         -> pad up to a multiple of 128.
    * tiny batch (< 128)               -> one full-batch tile (block dim equal
      to the full array dim is always legal).
    Tiles are capped at 1024 rows so bf16 double-buffered tiles (~8.5 MiB)
    stay well inside every generation's VMEM (incl. v7x's 64 MiB).
    """
    for tm in (1024, 512, 256, 128):
        if batch >= tm and batch % tm == 0:
            return tm, batch
    if batch >= 128:
        padded = ((batch + 127) // 128) * 128
        for tm in (1024, 512, 256, 128):
            if padded % tm == 0:
                return tm, padded
    return batch, batch


# ----------------------------------------------------------------------------
# Projection kernel: one single-shot matmul + bias per (modality, batch-tile)
# block.  Refs are 2-D tiles (modality axis squeezed away by the BlockSpec).
#   x: (tm, K) bf16   w: (K, P) bf16   b: (1, P) f32  ->  o: (tm, P) out_dtype
# ----------------------------------------------------------------------------
def _projection_kernel(x_ref, w_ref, b_ref, o_ref):
    y = jnp.dot(x_ref[...], w_ref[...], preferred_element_type=jnp.float32)
    o_ref[...] = (y + b_ref[...]).astype(o_ref.dtype)


def fused_pallas_projection(x_stacked, w_stacked, b_stacked, *, tm, out_dtype):
    """Both modalities in one pallas_call. Shapes:
       x: (2, B, K) bf16   w: (2, K, P) bf16   b: (2, 1, P) f32."""
    M, B, K = x_stacked.shape
    _, K2, P = w_stacked.shape
    assert K == K2 and B % tm == 0
    grid = (M, B // tm)
    return pl.pallas_call(
        _projection_kernel,
        out_shape=jax.ShapeDtypeStruct((M, B, P), out_dtype),
        grid_spec=pltpu.PrefetchScalarGridSpec(
            num_scalar_prefetch=0,
            grid=grid,
            in_specs=[
                pl.BlockSpec((pl.Squeezed(), tm, K), lambda m, i: (m, i, 0)),
                # constant (m, 0, 0) across the batch-tile axis -> weights and
                # bias stay resident in VMEM for all batch tiles of modality m.
                pl.BlockSpec((pl.Squeezed(), K, P), lambda m, i: (m, 0, 0)),
                pl.BlockSpec((pl.Squeezed(), 1, P), lambda m, i: (m, 0, 0)),
            ],
            out_specs=pl.BlockSpec((pl.Squeezed(), tm, P), lambda m, i: (m, i, 0)),
        ),
        compiler_params=pltpu.CompilerParams(
            # modality axis (size 2) parallel -> one per TensorCore on v7x;
            # batch-tile axis is also independent.
            dimension_semantics=("parallel", "parallel"),
        ),
    )(x_stacked, w_stacked, b_stacked)


def single_pallas_projection(x, w, b2d, *, tm, out_dtype):
    """Single-modality path (used when the two modality dims differ)."""
    B, K = x.shape
    K2, P = w.shape
    assert K == K2 and B % tm == 0
    return pl.pallas_call(
        _projection_kernel,
        out_shape=jax.ShapeDtypeStruct((B, P), out_dtype),
        grid_spec=pltpu.PrefetchScalarGridSpec(
            num_scalar_prefetch=0,
            grid=(B // tm,),
            in_specs=[
                pl.BlockSpec((tm, K), lambda i: (i, 0)),
                pl.BlockSpec((K, P), lambda i: (0, 0)),
                pl.BlockSpec((1, P), lambda i: (0, 0)),
            ],
            out_specs=pl.BlockSpec((tm, P), lambda i: (i, 0)),
        ),
        compiler_params=pltpu.CompilerParams(
            dimension_semantics=("parallel",),
        ),
    )(x, w, b2d)


# ----------------------------------------------------------------------------
# Jitted forward wrappers: bf16 cast / stack / padding fuse with the kernel
# dispatch under one jit.
# ----------------------------------------------------------------------------
@functools.partial(jax.jit, static_argnames=("out_dtype",))
def _fused_forward(x0, x1, w_stacked, b_stacked, out_dtype):
    B = x0.shape[0]
    tm, padded = _batch_tile_and_pad(B)
    x_stacked = jnp.stack(
        [x0.astype(jnp.bfloat16), x1.astype(jnp.bfloat16)], axis=0
    )  # (2, B, K) bf16
    if padded != B:
        x_stacked = jnp.pad(x_stacked, ((0, 0), (0, padded - B), (0, 0)))
    y = fused_pallas_projection(
        x_stacked, w_stacked, b_stacked, tm=tm, out_dtype=out_dtype
    )
    return y[0, :B], y[1, :B]


@functools.partial(jax.jit, static_argnames=("out_dtype",))
def _single_forward(x, w, b2d, out_dtype):
    B = x.shape[0]
    tm, padded = _batch_tile_and_pad(B)
    xb = x.astype(jnp.bfloat16)
    if padded != B:
        xb = jnp.pad(xb, ((0, padded - B), (0, 0)))
    y = single_pallas_projection(xb, w, b2d, tm=tm, out_dtype=out_dtype)
    return y[:B]


# ----------------------------------------------------------------------------
# Parameter init (matches the module's _initialize_weights: Xavier-uniform
# weights, zero bias).  Weights stored bf16 for the bandwidth-bound stream.
# ----------------------------------------------------------------------------
def xavier_uniform(key, fan_in, fan_out, dtype=jnp.float32):
    bound = (6.0 / (fan_in + fan_out)) ** 0.5
    # PyTorch weight is (out, in); we store its transpose (in, out) for y = x @ W.
    return jax.random.uniform(
        key, (fan_in, fan_out), dtype=dtype, minval=-bound, maxval=bound
    )


class BimodalEncoderPallas:
    """Pallas re-implementation of BimodalEncoder's forward (projection path).

    modalities=('codex', 'text'), shared_projection=False -> two independent
    nn.Linear(dim -> projection_dim) projections, one per modality, fused into
    a single Pallas call when the modality input dims match.
    """

    def __init__(
        self,
        key,
        modalities=("codex", "text"),
        codex_dim=768,
        text_dim=768,
        projection_dim=512,
        out_dtype=jnp.bfloat16,
    ):
        if len(modalities) != 2:
            raise ValueError("modalities must be a list of two modalities.")
        self.modalities = tuple(modalities)
        self.dims = {"codex": codex_dim, "text": text_dim}
        self.projection_dim = projection_dim
        self.out_dtype = out_dtype

        self.params = {}
        for i, modality in enumerate(self.modalities):
            wkey = jax.random.fold_in(key, i)
            d_in = self.dims[modality]
            w = xavier_uniform(wkey, d_in, projection_dim).astype(jnp.bfloat16)
            b = jnp.zeros((projection_dim,), dtype=jnp.float32)
            self.params[modality] = (w, b)

        # Pre-stack weights/biases ONCE (perf feedback: no per-forward stack).
        dims = [self.dims[m] for m in self.modalities]
        self.fused = len(set(dims)) == 1
        if self.fused:
            self.w_stacked = jnp.stack(
                [self.params[m][0] for m in self.modalities], axis=0
            )  # (2, K, P) bf16
            self.b_stacked = jnp.stack(
                [self.params[m][1].reshape(1, -1) for m in self.modalities], axis=0
            )  # (2, 1, P) f32

    def forward(self, data):
        # TODO(synk): external encoders (BiomedBERT / CodexCNNTransformer / PLIP)
        # are not part of this module; `data[modality]` holds pre-encoded
        # (batch, dim) features.
        outputs = {}
        if self.fused:
            m0, m1 = self.modalities
            y0, y1 = _fused_forward(
                data[m0], data[m1], self.w_stacked, self.b_stacked,
                out_dtype=self.out_dtype,
            )
            outputs[m0], outputs[m1] = y0, y1
        else:
            for m in self.modalities:
                w, b = self.params[m]
                outputs[m] = _single_forward(
                    data[m], w, b.reshape(1, -1), out_dtype=self.out_dtype
                )
        return outputs


# ----------------------------------------------------------------------------
# Demo / smoke test
# ----------------------------------------------------------------------------
if __name__ == "__main__":
    key = jax.random.PRNGKey(0)
    k_model, k_codex, k_text = jax.random.split(key, 3)

    batch = 2
    codex_dim = 768
    text_dim = 768
    projection_dim = 512

    model = BimodalEncoderPallas(
        k_model,
        modalities=("codex", "text"),
        codex_dim=codex_dim,
        text_dim=text_dim,
        projection_dim=projection_dim,
    )

    data = {
        "codex": jax.random.normal(k_codex, (batch, codex_dim), dtype=jnp.float32),
        "text": jax.random.normal(k_text, (batch, text_dim), dtype=jnp.float32),
    }

    outputs = model.forward(data)
    outputs = jax.tree_util.tree_map(jax.block_until_ready, outputs)

    # Sanity-check against a plain JAX reference computed with the same
    # intentional precision choices (bf16 inputs/weights, f32 accumulation,
    # bf16 output).
    ok = True
    for modality in model.modalities:
        w, b = model.params[modality]
        ref = (
            jnp.dot(
                data[modality].astype(jnp.bfloat16),
                w,
                preferred_element_type=jnp.float32,
            )
            + b
        ).astype(model.out_dtype)
        got = outputs[modality]
        assert got.shape == (batch, projection_dim), got.shape
        assert got.dtype == model.out_dtype, got.dtype
        ok &= bool(
            jnp.allclose(
                got.astype(jnp.float32), ref.astype(jnp.float32),
                atol=5e-2, rtol=5e-2,
            )
        )

    if ok:
        print("KERNEL_OK")
    else:
        print("KERNEL_MISMATCH")
</pallas_src>

<mosaic_0001>
module attributes {stable_mosaic.version = 11 : i64} {
  func.func @_projection_kernel(%arg0: i32, %arg1: i32, %arg2: memref<1x2x768xbf16, #tpu.memory_space<vmem>>, %arg3: memref<1x768x512xbf16, #tpu.memory_space<vmem>>, %arg4: memref<1x1x512xf32, #tpu.memory_space<vmem>>, %arg5: memref<1x2x512xbf16, #tpu.memory_space<vmem>>) attributes {dimension_semantics = [#tpu.dimension_semantics<parallel>, #tpu.dimension_semantics<parallel>], iteration_bounds = array<i64: 2, 1>, scalar_prefetch = 0 : i64, scratch_operands = 0 : i64, tpu.core_type = #tpu.core_type<tc>, window_params = [{transform_indices = @transform_0, window_bounds = array<i64: 1, 2, 768>}, {transform_indices = @transform_1, window_bounds = array<i64: 1, 768, 512>}, {transform_indices = @transform_2, window_bounds = array<i64: 1, 1, 512>}, {transform_indices = @transform_3, window_bounds = array<i64: 1, 2, 512>}]} {
    %c0 = arith.constant 0 : index
    %c0_0 = arith.constant 0 : index
    %c0_1 = arith.constant 0 : index
    %0 = vector.load %arg2[%c0, %c0_0, %c0_1] : memref<1x2x768xbf16, #tpu.memory_space<vmem>>, vector<1x2x768xbf16>
    %1 = vector.shape_cast %0 : vector<1x2x768xbf16> to vector<2x768xbf16>
    %c0_2 = arith.constant 0 : index
    %c0_3 = arith.constant 0 : index
    %c0_4 = arith.constant 0 : index
    %2 = vector.load %arg3[%c0_2, %c0_3, %c0_4] : memref<1x768x512xbf16, #tpu.memory_space<vmem>>, vector<1x768x512xbf16>
    %3 = vector.shape_cast %2 : vector<1x768x512xbf16> to vector<768x512xbf16>
    %cst = arith.constant dense<0.000000e+00> : vector<2x512xf32>
    %4 = tpu.matmul %1, %3, %cst {dimension_numbers = #tpu.dot_dimension_numbers<[1], [0], [0], [1], [0, 0, 1, 1], [], []>} : vector<2x768xbf16>, vector<768x512xbf16>, vector<2x512xf32> -> vector<2x512xf32>
    %c0_5 = arith.constant 0 : index
    %c0_6 = arith.constant 0 : index
    %c0_7 = arith.constant 0 : index
    %5 = vector.load %arg4[%c0_5, %c0_6, %c0_7] : memref<1x1x512xf32, #tpu.memory_space<vmem>>, vector<1x1x512xf32>
    %6 = vector.shape_cast %5 : vector<1x1x512xf32> to vector<1x512xf32>
    %7 = vector.broadcast %6 : vector<1x512xf32> to vector<2x512xf32>
    %8 = arith.addf %4, %7 : vector<2x512xf32>
    %9 = arith.truncf %8 : vector<2x512xf32> to vector<2x512xbf16>
    %c0_8 = arith.constant 0 : index
    %c0_9 = arith.constant 0 : index
    %c0_10 = arith.constant 0 : index
    %10 = vector.load %arg5[%c0_8, %c0_9, %c0_10] : memref<1x2x512xbf16, #tpu.memory_space<vmem>>, vector<1x2x512xbf16>
    %11 = vector.shape_cast %10 : vector<1x2x512xbf16> to vector<2x512xbf16>
    %12 = vector.shape_cast %9 : vector<2x512xbf16> to vector<1x2x512xbf16>
    tpu.vector_store %arg5[%c0_8, %c0_9, %c0_10], %12 {strides = array<i32>} : memref<1x2x512xbf16, #tpu.memory_space<vmem>>, vector<1x2x512xbf16>,
    return
  }
  func.func @transform_0(%arg0: i32, %arg1: i32) -> (i32, i32, i32) {
    %c0_i32 = arith.constant 0 : i32
    %c0_i32_0 = arith.constant 0 : i32
    return %arg0, %arg1, %c0_i32 : i32, i32, i32
  }
  func.func @transform_1(%arg0: i32, %arg1: i32) -> (i32, i32, i32) {
    %c0_i32 = arith.constant 0 : i32
    %c0_i32_0 = arith.constant 0 : i32
    %c0_i32_1 = arith.constant 0 : i32
    return %arg0, %c0_i32, %c0_i32_0 : i32, i32, i32
  }
  func.func @transform_2(%arg0: i32, %arg1: i32) -> (i32, i32, i32) {
    %c0_i32 = arith.constant 0 : i32
    %c0_i32_0 = arith.constant 0 : i32
    %c0_i32_1 = arith.constant 0 : i32
    return %arg0, %c0_i32, %c0_i32_0 : i32, i32, i32
  }
  func.func @transform_3(%arg0: i32, %arg1: i32) -> (i32, i32, i32) {
    %c0_i32 = arith.constant 0 : i32
    %c0_i32_0 = arith.constant 0 : i32
    return %arg0, %arg1, %c0_i32 : i32, i32, i32
  }
}

</mosaic_0001>

<bundles_post_ra>
// kernel: _fused_forward.1
= control target key start
LH: loop header
LB: loop body
LE: loop exit
PB: predicated region body
PF: predicated region fallthrough
CT: control target
= control target key end

     0   :  { %8 = vsyncpa [#allocation3], 0  ;;  %s3635_s0 = inlined_call_operand.vmem [shape: bf16[2,2,768], index: 0, kind: input, shape index: {}]   ;;  %s3636_s1 = inlined_call_operand.hbm [shape: bf16[2,768,512], index: 1, kind: input, shape index: {}]   ;;  %s3637_s2 = inlined_call_operand.hbm [shape: f32[2,1,512], index: 2, kind: input, shape index: {}]   ;;  %s3638_s3 = inlined_call_operand.vmem [shape: bf16[2,2,512], index: 3, kind: output, shape index: {}]  }
   0x1   :  { %10 = vsyncpa [#allocation3 + $0x1], 0 }
   0x2   :  { %11 = vsyncpa [#allocation5], 0 }
   0x3   :  { %13 = vsyncpa [#allocation5 + $0x1], 0  ;;  %s3101_s12 = smov 0   ;;  %s3103_s13 = smov 0  }
   0x4   :  { %s3105_s14 = smov 0   ;;  %s3107_s15 = smov 0  }
   0x5   :  { %s3109_s16 = smov 0   ;;  %s3111_s17 = smov 0  }
   0x6 LB: > { %s1921_s18 = sadd.s32 4294967295, %s3077_s17   ;;  %s31_s19 = sadd.s32 1, %s3073_s16  ;;  %s3077_s17 = sphi %s3111_s17, %s19_s17   ;;  %s3073_s16 = sphi %s3109_s16, %s3645_s16   ;;  %s3069_s15 = sphi %s3107_s15, %s3644_s15   ;;  %s3065_s14 = sphi %s3105_s14, %s3643_s14   ;;  %s3061_s13 = sphi %s3103_s13, %s3642_s13   ;;  %s3057_s12 = sphi %s3101_s12, %s3641_s12  }
   0x7   : > { %p33_p0 = scmp.ge.s32.totalorder %s31_s19, 2  ;;  %s66_s20 = sadd.s32 1, %s3065_s14 }
   0x8   : > { %p73_p1 = scmp.ne.s32.totalorder %s3065_s14, %s3061_s13  ;;  %p74_p2 = scmp.eq.s32.totalorder %s3077_s17, 0 }
   0x9   : > { %s3647_s19 = smov (%p33_p0, %s31_s19), 0  ;;  %p79_p4 = scmp.ne.s32.totalorder %s3061_s13, %s3057_s12 }
   0xa   : > { %p75_p3 = por %p74_p2, %p73_p1  ;;  %s63_s21 = ssub.s32 %s3073_s16, %s3647_s19 }
   0xb   : > { %p80_p5 = scmp.eq.s32.totalorder %s1921_s18, 0  ;;  %p64_p6 = scmp.eq.s32.totalorder %s63_s21, 0 }
   0xc   : > { %p2908_p8 = scmp.lt.s32.totalorder %s3077_s17, 2  ;;  %s168_s24 = sand.u32 1, %s3065_s14  }
   0xd   : > { %p3140_p7 = por %p80_p5, %p79_p4  ;;  %s2894_s25 = smul.u32 1536, %s3073_s16 }
   0xe   : > { %s3146_s23 = scalar_select %p64_p6, %s3065_s14, %s66_s20  }
   0xf   : > { %s2893_s26 = smul.u32 1536, %s168_s24  ;;  %s177_s29 = scalar_lea.hbm %s3636_s1, %s2894_s25 }
  0x10   : > { %p3153_p9 = pnand %p2908_p8, %p75_p3  ;;  %s178_s4 = sshll.u32 %s177_s29, 4  ;;  %s179_s4 = int_to_ptr.hbm [resolvable:$true] %s178_s4 }
  0x11   : > { %s172_s5 = scalar_lea.vmem [#allocation2], %s2893_s26  ;;  %s169_s7 = scalar_lea.sflag [#allocation3], %s168_s24 }
  0x12   : > { %s180_s6 = sshll.u32 %s172_s5, 4  ;;  %s3079_s8 = smov 256   ;;  %s181_s6 = int_to_ptr.vmem [resolvable:$true] %s180_s6 }
  0x13   : > { %s3080_s9 = smov 16   ;;  %p1928_p10 = scmp.ge.s32.totalorder %s3077_s17, 1 }
  0x14   : > { %2904 = dma.hbm_to_vmem [thread:$0]  (!%p3153_p9), %s179_s4, 24576, %s181_s6, %s169_s7, %s3079_s8, %s3079_s8, %s3080_s9  }
  0x15   : > { %p207_p11 = scmp.lt.s32.totalorder %s3077_s17, 3  ;;  %s1926_s10 = sshll.u32 %s168_s24, 2 }
  0x16   : > { %s1927_s11 = sshll.u32 %s3073_s16, 2  ;;  %s194_s12 = scalar_lea.vmem [#allocation4], %s1926_s10 }
  0x17   : > { %p208_p12 = pnand %p1928_p10, %p207_p11  ;;  %s202_s18 = sshll.u32 %s194_s12, 4  ;;  %s203_s18 = int_to_ptr.vmem [resolvable:$true] %s202_s18 }
  0x18   : > { %s198_s25 = scalar_lea.hbm %s3637_s2, %s1927_s11  ;;  %s191_s27 = scalar_lea.sflag [#allocation5], %s168_s24 }
  0x19   : > { %s200_s26 = sshll.u32 %s198_s25, 4  ;;  %211 = sbr.rel (%p208_p12) target bundleno = 374 (0x176), region = 32  ;;  %s201_s26 = int_to_ptr.hbm [resolvable:$true] %s200_s26 }
  0x1a   : > { %2907 = dma.hbm_to_vmem [thread:$0]  (!%p3153_p9), %s201_s26, 64, %s203_s18, %s191_s27  }
  0x1b   : > { %s213_s28 = sand.u32 (!%p208_p12), 1, %s3061_s13  }
  0x1c   : > { %s2895_s29 = smul.u32 (!%p208_p12), 1536, %s213_s28  ;;  %s214_s4 = scalar_lea.sflag (!%p208_p12), [#allocation3], %s213_s28 }
  0x1e   : > { %s3168_s5 = scalar_lea.vmem [#allocation2], %s2895_s29 }
  0x1f   : > { %3048 = dma.done.wait (%p3140_p7), %s214_s4, 24576  }
  0x20   : > { %3050 = vsyncadd (%p3140_p7), %s214_s4, 4294942720  ;;  %s1929_s6 = sshll.u32 %s213_s28, 2  ;;  %s224_s7 = scalar_lea.sflag [#allocation5], %s213_s28 }
  0x21   : > { %s3174_s8 = scalar_lea.vmem [#allocation4], %s1929_s6 }
  0x22   : > { %3052 = dma.done.wait (%p3140_p7), %s224_s7, 64  }
  0x23   : > { %3054 = vsyncadd (%p3140_p7), %s224_s7, 4294967232  ;;  %v2045_v0 = vld [vmem:[%s3168_s5 + $0xe0] sm:$0xf]  ;;  %v2731_v1 = vld [vmem:[%s3168_s5 + $0xec] sm:$0xf0]  ;;  %p267_p13 = scmp.lt.s32.totalorder %s3069_s15, 1 }
  0x24   : > { %v2173_v2 = vld [vmem:[%s3168_s5 + $0x1e0] sm:$0xf]  ;;  %v2046_v3 = vor.u32 %v2731_v1, %v2045_v0  ;;  %v2763_v4 = vld [vmem:[%s3168_s5 + $0x1ec] sm:$0xf0]  ;;  %vm1779_vm0 = vcmask 1040384   ;;  %vm1783_vm1 = vcmask 1042434  }
  0x25   : > { %v2301_v5 = vld [vmem:[%s3168_s5 + $0x2e0] sm:$0xf]  ;;  %v2795_v6 = vld [vmem:[%s3168_s5 + $0x2ec] sm:$0xf0]  ;;  %v2174_v7 = vor.u32 %v2763_v4, %v2173_v2  ;;  %s3649_s15 = smov (!%p267_p13, %s3069_s15), 1  ;;  %vm1787_vm2 = vcmask 1041408  }
  0x26   : > { %v2302_v8 = vor.u32 %v2795_v6, %v2301_v5  ;;  %v2429_v9 = vld [vmem:[%s3168_s5 + $0x3e0] sm:$0xf]  ;;  %v2827_v10 = vld [vmem:[%s3168_s5 + $0x3ec] sm:$0xf0]  ;;  %1460 = vmatpush.bf16.msra.mxu0 %v2046_v3  ;;  %s2896_s22 = smul.u32 6, %s3649_s15  ;;  %s1930_s10 = sshll.u32 %s3649_s15, 2 }
  0x27   : > { %v2029_v11 = vld [vmem:[%s3168_s5 + $0xc0] sm:$0xf]  ;;  %v2430_v12 = vor.u32 %v2827_v10, %v2429_v9  ;;  %v2727_v13 = vld [vmem:[%s3168_s5 + $0xcc] sm:$0xf0]  ;;  %1473 = vmatpush.bf16.msra.mxu1 %v2174_v7  ;;  %s282_s18 = scalar_lea.vmem %s3638_s3, %s1930_s10 }
  0x28   : > { %v2157_v14 = vld [vmem:[%s3168_s5 + $0x1c0] sm:$0xf]  ;;  %v2759_v15 = vld [vmem:[%s3168_s5 + $0x1cc] sm:$0xf0]  ;;  %1486 = vmatpush.bf16.msra.mxu2 %v2302_v8  ;;  %v2030_v16 = vor.u32 %v2727_v13, %v2029_v11  ;;  %s274_s9 = scalar_lea.vmem %s3635_s0, %s2896_s22 }
  0x29   : > { %v2158_v17 = vor.u32 %v2759_v15, %v2157_v14  ;;  %v2285_v18 = vld [vmem:[%s3168_s5 + $0x2c0] sm:$0xf]  ;;  %v2791_v19 = vld [vmem:[%s3168_s5 + $0x2cc] sm:$0xf0]  ;;  %1499 = vmatpush.bf16.msra.mxu3 %v2430_v12 }
  0x2a   : > { %v2413_v20 = vld [vmem:[%s3168_s5 + $0x3c0] sm:$0xf]  ;;  %v2286_v21 = vor.u32 %v2791_v19, %v2285_v18  ;;  %v2823_v22 = vld [vmem:[%s3168_s5 + $0x3cc] sm:$0xf0]  ;;  %1461 = vmatpush.bf16.msra.mxu0 %v2030_v16 }
  0x2b   : > { %v2013_v23 = vld [vmem:[%s3168_s5 + $0xa0] sm:$0xf]  ;;  %v2723_v24 = vld [vmem:[%s3168_s5 + $0xac] sm:$0xf0]  ;;  %v2414_v25 = vor.u32 %v2823_v22, %v2413_v20  ;;  %1474 = vmatpush.bf16.msra.mxu1 %v2158_v17 }
  0x2c   : > { %v2141_v26 = vld [vmem:[%s3168_s5 + $0x1a0] sm:$0xf]  ;;  %v2755_v27 = vld [vmem:[%s3168_s5 + $0x1ac] sm:$0xf0]  ;;  %v2014_v29 = vor.u32 %v2723_v24, %v2013_v23  ;;  %1487 = vmatpush.bf16.msra.mxu2 %v2286_v21 }
  0x2d   : > { %v2269_v28 = vld [vmem:[%s3168_s5 + $0x2a0] sm:$0xf]  ;;  %v2787_v30 = vld [vmem:[%s3168_s5 + $0x2ac] sm:$0xf0]  ;;  %v2142_v33 = vor.u32 %v2755_v27, %v2141_v26  ;;  %1500 = vmatpush.bf16.msra.mxu3 %v2414_v25 }
  0x2e   : > { %v2397_v31 = vld [vmem:[%s3168_s5 + $0x3a0] sm:$0xf]  ;;  %v2819_v32 = vld [vmem:[%s3168_s5 + $0x3ac] sm:$0xf0]  ;;  %v2270_v34 = vor.u32 %v2787_v30, %v2269_v28  ;;  %1462 = vmatpush.bf16.msra.mxu0 %v2014_v29 }
  0x2f   : > { %v1997_v35 = vld [vmem:[%s3168_s5 + $0x80] sm:$0xf]  ;;  %v2719_v36 = vld [vmem:[%s3168_s5 + $0x8c] sm:$0xf0]  ;;  %v2398_v38 = vor.u32 %v2819_v32, %v2397_v31  ;;  %1475 = vmatpush.bf16.msra.mxu1 %v2142_v33  ;;  %v2729_v33 = vld [vmem:[%s3168_s5 + $0xe4] sm:$0xf] }
  0x30   : > { %v2125_v37 = vld [vmem:[%s3168_s5 + $0x180] sm:$0xf]  ;;  %v2751_v39 = vld [vmem:[%s3168_s5 + $0x18c] sm:$0xf0]  ;;  %v1998_v44 = vor.u32 %v2719_v36, %v1997_v35  ;;  %1488 = vmatpush.bf16.msra.mxu2 %v2270_v34  ;;  %v2047_v34 = vld [vmem:[%s3168_s5 + $0xf0] sm:$0xf0] }
  0x31   : > { %v2253_v40 = vld [vmem:[%s3168_s5 + $0x280] sm:$0xf]  ;;  %v2783_v41 = vld [vmem:[%s3168_s5 + $0x28c] sm:$0xf0]  ;;  %v2126_v45 = vor.u32 %v2751_v39, %v2125_v37  ;;  %1501 = vmatpush.bf16.msra.mxu3 %v2398_v38  ;;  %v2761_v37 = vld [vmem:[%s3168_s5 + $0x1e4] sm:$0xf] }
  0x32   : > { %v2381_v42 = vld [vmem:[%s3168_s5 + $0x380] sm:$0xf]  ;;  %v2815_v43 = vld [vmem:[%s3168_s5 + $0x38c] sm:$0xf0]  ;;  %v2254_v46 = vor.u32 %v2783_v41, %v2253_v40  ;;  %1463 = vmatpush.bf16.msra.mxu0 %v1998_v44  ;;  %v2175_v38 = vld [vmem:[%s3168_s5 + $0x1f0] sm:$0xf0] }
  0x33   : > { %v1981_v47 = vld [vmem:[%s3168_s5 + $0x60] sm:$0xf]  ;;  %v2715_v48 = vld [vmem:[%s3168_s5 + $0x6c] sm:$0xf0]  ;;  %v2382_v50 = vor.u32 %v2815_v43, %v2381_v42  ;;  %1476 = vmatpush.bf16.msra.mxu1 %v2126_v45  ;;  %v2050_v42 = vor.u32 %v2729_v33, %v2047_v34 }
  0x34   : > { %v2109_v49 = vld [vmem:[%s3168_s5 + $0x160] sm:$0xf]  ;;  %v2747_v51 = vld [vmem:[%s3168_s5 + $0x16c] sm:$0xf0]  ;;  %v1982_v56 = vor.u32 %v2715_v48, %v1981_v47  ;;  %1489 = vmatpush.bf16.msra.mxu2 %v2254_v46  ;;  %v2178_v46 = vor.u32 %v2761_v37, %v2175_v38  ;;  %v2725_v48 = vld [vmem:[%s3168_s5 + $0xc4] sm:$0xf] }
  0x35   : > { %v2237_v52 = vld [vmem:[%s3168_s5 + $0x260] sm:$0xf]  ;;  %v2779_v53 = vld [vmem:[%s3168_s5 + $0x26c] sm:$0xf0]  ;;  %v2110_v57 = vor.u32 %v2747_v51, %v2109_v49  ;;  %1502 = vmatpush.bf16.msra.mxu3 %v2382_v50  ;;  %v2031_v49 = vld [vmem:[%s3168_s5 + $0xd0] sm:$0xf0] }
  0x36   : > { %v2365_v54 = vld [vmem:[%s3168_s5 + $0x360] sm:$0xf]  ;;  %v2811_v55 = vld [vmem:[%s3168_s5 + $0x36c] sm:$0xf0]  ;;  %v2238_v58 = vor.u32 %v2779_v53, %v2237_v52  ;;  %1464 = vmatpush.bf16.msra.mxu0 %v1982_v56  ;;  %v2757_v50 = vld [vmem:[%s3168_s5 + $0x1c4] sm:$0xf] }
  0x37   : > { %v1965_v59 = vld [vmem:[%s3168_s5 + $0x40] sm:$0xf]  ;;  %v2711_v60 = vld [vmem:[%s3168_s5 + $0x4c] sm:$0xf0]  ;;  %v2366_v62 = vor.u32 %v2811_v55, %v2365_v54  ;;  %1477 = vmatpush.bf16.msra.mxu1 %v2110_v57  ;;  %v2159_v51 = vld [vmem:[%s3168_s5 + $0x1d0] sm:$0xf0]  ;;  %v2034_v54 = vor.u32 %v2725_v48, %v2031_v49 }
  0x38   : > { %v2093_v61 = vld [vmem:[%s3168_s5 + $0x140] sm:$0xf]  ;;  %v2743_v63 = vld [vmem:[%s3168_s5 + $0x14c] sm:$0xf0]  ;;  %v1966_v4 = vor.u32 %v2711_v60, %v1965_v59  ;;  %1490 = vmatpush.bf16.msra.mxu2 %v2238_v58  ;;  %v2162_v58 = vor.u32 %v2757_v50, %v2159_v51  ;;  %v2721_v60 = vld [vmem:[%s3168_s5 + $0xa4] sm:$0xf] }
  0x39   : > { %v2221_v0 = vld [vmem:[%s3168_s5 + $0x240] sm:$0xf]  ;;  %v2775_v1 = vld [vmem:[%s3168_s5 + $0x24c] sm:$0xf0]  ;;  %v2094_v5 = vor.u32 %v2743_v63, %v2093_v61  ;;  %1503 = vmatpush.bf16.msra.mxu3 %v2366_v62  ;;  %v2015_v61 = vld [vmem:[%s3168_s5 + $0xb0] sm:$0xf0] }
  0x3a   : > { %v2349_v2 = vld [vmem:[%s3168_s5 + $0x340] sm:$0xf]  ;;  %v2807_v3 = vld [vmem:[%s3168_s5 + $0x34c] sm:$0xf0]  ;;  %v2222_v6 = vor.u32 %v2775_v1, %v2221_v0  ;;  %1465 = vmatpush.bf16.msra.mxu0 %v1966_v4  ;;  %v2753_v62 = vld [vmem:[%s3168_s5 + $0x1a4] sm:$0xf]  ;;  %v2018_v4 = vor.u32 %v2721_v60, %v2015_v61 }
  0x3b   : > { %v1949_v7 = vld [vmem:[%s3168_s5 + $0x20] sm:$0xf]  ;;  %v2707_v8 = vld [vmem:[%s3168_s5 + $0x2c] sm:$0xf0]  ;;  %v2350_v10 = vor.u32 %v2807_v3, %v2349_v2  ;;  %1478 = vmatpush.bf16.msra.mxu1 %v2094_v5  ;;  %v2143_v63 = vld [vmem:[%s3168_s5 + $0x1b0] sm:$0xf0] }
  0x3c   : > { %v2077_v9 = vld [vmem:[%s3168_s5 + $0x120] sm:$0xf]  ;;  %v2739_v11 = vld [vmem:[%s3168_s5 + $0x12c] sm:$0xf0]  ;;  %v1950_v16 = vor.u32 %v2707_v8, %v1949_v7  ;;  %1491 = vmatpush.bf16.msra.mxu2 %v2222_v6  ;;  %v283_v2 = vld [vmem:[%s274_s9] sm:$0x3f]  ;;  %v2146_v7 = vor.u32 %v2753_v62, %v2143_v63 }
  0x3d   : > { %v2205_v12 = vld [vmem:[%s3168_s5 + $0x220] sm:$0xf]  ;;  %v2771_v13 = vld [vmem:[%s3168_s5 + $0x22c] sm:$0xf0]  ;;  %v2078_v19 = vor.u32 %v2739_v11, %v2077_v9  ;;  %1504 = vmatpush.bf16.msra.mxu3 %v2350_v10  ;;  %487 = vst [vmem:[#allocation1] ss:$9 sm:$0xff] %v283_v2 }
  0x3e   : > { %v2333_v14 = vld [vmem:[%s3168_s5 + $0x320] sm:$0xf]  ;;  %v2803_v15 = vld [vmem:[%s3168_s5 + $0x32c] sm:$0xf0]  ;;  %v2206_v20 = vor.u32 %v2771_v13, %v2205_v12  ;;  %1466 = vmatpush.bf16.msra.mxu0 %v1950_v16  ;;  %v2717_v9 = vld [vmem:[%s3168_s5 + $0x84] sm:$0xf] }
  0x3f   : > { %v1933_v17 = vld [vmem:[%s3168_s5] sm:$0xf]  ;;  %v2703_v18 = vld [vmem:[%s3168_s5 + $0xc] sm:$0xf0]  ;;  %v2334_v24 = vor.u32 %v2803_v15, %v2333_v14  ;;  %1479 = vmatpush.bf16.msra.mxu1 %v2078_v19  ;;  %v1999_v10 = vld [vmem:[%s3168_s5 + $0x90] sm:$0xf0] }
  0x40   : > { %v2061_v21 = vld [vmem:[%s3168_s5 + $0x100] sm:$0xf]  ;;  %v2735_v22 = vld [vmem:[%s3168_s5 + $0x10c] sm:$0xf0]  ;;  %v1934_v31 = vor.u32 %v2703_v18, %v1933_v17  ;;  %1492 = vmatpush.bf16.msra.mxu2 %v2206_v20  ;;  %v2749_v11 = vld [vmem:[%s3168_s5 + $0x184] sm:$0xf]  ;;  %v2002_v15 = vor.u32 %v2717_v9, %v1999_v10 }
  0x41   : > { %v2189_v23 = vld [vmem:[%s3168_s5 + $0x200] sm:$0xf]  ;;  %v2767_v25 = vld [vmem:[%s3168_s5 + $0x20c] sm:$0xf0]  ;;  %v2062_v35 = vor.u32 %v2735_v22, %v2061_v21  ;;  %1505 = vmatpush.bf16.msra.mxu3 %v2334_v24  ;;  %v2127_v12 = vld [vmem:[%s3168_s5 + $0x190] sm:$0xf0] }
  0x42   : > { %v2317_v26 = vld [vmem:[%s3168_s5 + $0x300] sm:$0xf]  ;;  %v2799_v27 = vld [vmem:[%s3168_s5 + $0x30c] sm:$0xf0]  ;;  %v2190_v36 = vor.u32 %v2767_v25, %v2189_v23  ;;  %1467 = vmatpush.bf16.msra.mxu0 %v1934_v31  ;;  %v2130_v19 = vor.u32 %v2749_v11, %v2127_v12  ;;  %v2713_v21 = vld [vmem:[%s3168_s5 + $0x64] sm:$0xf] }
  0x43   : > { %v2557_v28 = vld [vmem:[%s3168_s5 + $0x4e0] sm:$0xf]  ;;  %v2859_v29 = vld [vmem:[%s3168_s5 + $0x4ec] sm:$0xf0]  ;;  %v2318_v39 = vor.u32 %v2799_v27, %v2317_v26  ;;  %1480 = vmatpush.bf16.msra.mxu1 %v2062_v35  ;;  %v1983_v22 = vld [vmem:[%s3168_s5 + $0x70] sm:$0xf0] }
  0x44   : > { %v2685_v30 = vld [vmem:[%s3168_s5 + $0x5e0] sm:$0xf]  ;;  %v2891_v32 = vld [vmem:[%s3168_s5 + $0x5ec] sm:$0xf0]  ;;  %v2558_v40 = vor.u32 %v2859_v29, %v2557_v28  ;;  %1493 = vmatpush.bf16.msra.mxu2 %v2190_v36  ;;  %v2745_v23 = vld [vmem:[%s3168_s5 + $0x164] sm:$0xf]  ;;  %v1986_v31 = vor.u32 %v2713_v21, %v1983_v22 }
  0x45   : > { %v2686_v41 = vor.u32 %v2891_v32, %v2685_v30  ;;  %v2541_v43 = vld [vmem:[%s3168_s5 + $0x4c0] sm:$0xf]  ;;  %v2855_v44 = vld [vmem:[%s3168_s5 + $0x4cc] sm:$0xf0]  ;;  %1506 = vmatpush.bf16.msra.mxu3 %v2318_v39  ;;  %v2111_v24 = vld [vmem:[%s3168_s5 + $0x170] sm:$0xf0] }
  0x46   : > { %v2669_v45 = vld [vmem:[%s3168_s5 + $0x5c0] sm:$0xf]  ;;  %v2887_v47 = vld [vmem:[%s3168_s5 + $0x5cc] sm:$0xf0]  ;;  %1512 = vmatpush.bf16.msrb.mxu0 %v2558_v40  ;;  %v2542_v52 = vor.u32 %v2855_v44, %v2541_v43  ;;  %v3297_v28 = vld [vmem:[#allocation1] sm:$0xff]  ;;  %v2114_v35 = vor.u32 %v2745_v23, %v2111_v24 }
  0x47   : > { %1525 = vmatpush.bf16.msrb.mxu1 %v2686_v41  ;;  %v2670_v53 = vor.u32 %v2887_v47, %v2669_v45  ;;  %v2525_v55 = vld [vmem:[%s3168_s5 + $0x4a0] sm:$0xf]  ;;  %v2851_v56 = vld [vmem:[%s3168_s5 + $0x4ac] sm:$0xf0]  ;;  %v2709_v37 = vld [vmem:[%s3168_s5 + $0x44] sm:$0xf]  ;;  %1468 = vmatmul.bf16.vlgmr.msra.gmra.mxu0 %v3297_v28 }
  0x48   : > { %1538 = vmatpush.bf16.msrb.mxu2 %v2050_v42  ;;  %v2653_v57 = vld [vmem:[%s3168_s5 + $0x5a0] sm:$0xf]  ;;  %v2883_v59 = vld [vmem:[%s3168_s5 + $0x5ac] sm:$0xf0]  ;;  %v2526_v0 = vor.u32 %v2851_v56, %v2525_v55  ;;  %v1967_v38 = vld [vmem:[%s3168_s5 + $0x50] sm:$0xf0] }
  0x49   : > { %1551 = vmatpush.bf16.msrb.mxu3 %v2178_v46  ;;  %v2509_v1 = vld [vmem:[%s3168_s5 + $0x480] sm:$0xf]  ;;  %v2654_v3 = vor.u32 %v2883_v59, %v2653_v57  ;;  %v2847_v5 = vld [vmem:[%s3168_s5 + $0x48c] sm:$0xf0]  ;;  %v2741_v39 = vld [vmem:[%s3168_s5 + $0x144] sm:$0xf]  ;;  %v1970_v43 = vor.u32 %v2709_v37, %v1967_v38 }
  0x4a   : > { %1513 = vmatpush.bf16.msrb.mxu0 %v2542_v52  ;;  %v2637_v6 = vld [vmem:[%s3168_s5 + $0x580] sm:$0xf]  ;;  %v2879_v8 = vld [vmem:[%s3168_s5 + $0x58c] sm:$0xf0]  ;;  %v2510_v13 = vor.u32 %v2847_v5, %v2509_v1  ;;  %v2095_v40 = vld [vmem:[%s3168_s5 + $0x150] sm:$0xf0] }
  0x4b   : > { %1526 = vmatpush.bf16.msrb.mxu1 %v2670_v53  ;;  %v2638_v14 = vor.u32 %v2879_v8, %v2637_v6  ;;  %v2493_v16 = vld [vmem:[%s3168_s5 + $0x460] sm:$0xf]  ;;  %v2843_v17 = vld [vmem:[%s3168_s5 + $0x46c] sm:$0xf0]  ;;  %v2098_v47 = vor.u32 %v2741_v39, %v2095_v40  ;;  %v2705_v49 = vld [vmem:[%s3168_s5 + $0x24] sm:$0xf] }
  0x4c   : > { %1539 = vmatpush.bf16.msrb.mxu2 %v2034_v54  ;;  %v2621_v18 = vld [vmem:[%s3168_s5 + $0x560] sm:$0xf]  ;;  %v2875_v20 = vld [vmem:[%s3168_s5 + $0x56c] sm:$0xf0]  ;;  %v2494_v26 = vor.u32 %v2843_v17, %v2493_v16  ;;  %v1951_v50 = vld [vmem:[%s3168_s5 + $0x30] sm:$0xf0] }
  0x4d   : > { %1552 = vmatpush.bf16.msrb.mxu3 %v2162_v58  ;;  %v2477_v25 = vld [vmem:[%s3168_s5 + $0x440] sm:$0xf]  ;;  %v3295_v27 = vld [vmem:[#allocation1 + $0x12] sm:$0xff]  ;;  %v3299_v29 = vld [vmem:[#allocation1 + $0x1b] sm:$0xff]  ;;  %v2622_v30 = vor.u32 %v2875_v20, %v2621_v18  ;;  %v1954_v57 = vor.u32 %v2705_v49, %v1951_v50 }
  0x4e   : > { %1514 = vmatpush.bf16.msrb.mxu0 %v2526_v0  ;;  %v2839_v32 = vld [vmem:[%s3168_s5 + $0x44c] sm:$0xf0]  ;;  %v2605_v33 = vld [vmem:[%s3168_s5 + $0x540] sm:$0xf]  ;;  %1494 = vmatmul.bf16.vlgmr.msra.gmra.mxu2 %v3295_v27  ;;  %v2737_v51 = vld [vmem:[%s3168_s5 + $0x124] sm:$0xf] }
  0x4f   : > { %1527 = vmatpush.bf16.msrb.mxu1 %v2654_v3  ;;  %v3303_v34 = vld [vmem:[#allocation1 + $0x9] sm:$0xff]  ;;  %v2871_v36 = vld [vmem:[%s3168_s5 + $0x54c] sm:$0xf0]  ;;  %1507 = vmatmul.bf16.vlgmr.msra.gmra.mxu3 %v3299_v29  ;;  %v2478_v41 = vor.u32 %v2839_v32, %v2477_v25  ;;  %v2079_v52 = vld [vmem:[%s3168_s5 + $0x130] sm:$0xf0] }
  0x50   : > { %1540 = vmatpush.bf16.msrb.mxu2 %v2018_v4  ;;  %1481 = vmatmul.bf16.vlgmr.msra.gmra.mxu1 %v3303_v34  ;;  %v2606_v42 = vor.u32 %v2871_v36, %v2605_v33  ;;  %v2461_v44 = vld [vmem:[%s3168_s5 + $0x420] sm:$0xf]  ;;  %v2835_v45 = vld [vmem:[%s3168_s5 + $0x42c] sm:$0xf0]  ;;  %v2701_v60 = vld [vmem:[%s3168_s5 + $0x4] sm:$0xf]  ;;  %v2082_v61 = vor.u32 %v2737_v51, %v2079_v52 }
  0x51   : > { %1553 = vmatpush.bf16.msrb.mxu3 %v2146_v7  ;;  %v2589_v46 = vld [vmem:[%s3168_s5 + $0x520] sm:$0xf]  ;;  %v2867_v48 = vld [vmem:[%s3168_s5 + $0x52c] sm:$0xf0]  ;;  %v2462_v53 = vor.u32 %v2835_v45, %v2461_v44  ;;  %v1935_v62 = vld [vmem:[%s3168_s5 + $0x10] sm:$0xf0] }
  0x52   : > { %1515 = vmatpush.bf16.msrb.mxu0 %v2510_v13  ;;  %v2445_v54 = vld [vmem:[%s3168_s5 + $0x400] sm:$0xf]  ;;  %v2831_v55 = vld [vmem:[%s3168_s5 + $0x40c] sm:$0xf0]  ;;  %v2590_v56 = vor.u32 %v2867_v48, %v2589_v46  ;;  %v2733_v63 = vld [vmem:[%s3168_s5 + $0x104] sm:$0xf]  ;;  %v1938_v9 = vor.u32 %v2701_v60, %v1935_v62 }
  0x53   : > { %1528 = vmatpush.bf16.msrb.mxu1 %v2638_v14  ;;  %v2573_v58 = vld [vmem:[%s3168_s5 + $0x500] sm:$0xf]  ;;  %v2863_v59 = vld [vmem:[%s3168_s5 + $0x50c] sm:$0xf0]  ;;  %v2063_v0 = vld [vmem:[%s3168_s5 + $0x110] sm:$0xf0]  ;;  %v2446_v4 = vor.u32 %v2831_v55, %v2445_v54 }
  0x54   : > { %1541 = vmatpush.bf16.msrb.mxu2 %v2002_v15  ;;  %v2793_v1 = vld [vmem:[%s3168_s5 + $0x2e4] sm:$0xf]  ;;  %v2303_v2 = vld [vmem:[%s3168_s5 + $0x2f0] sm:$0xf0]  ;;  %v2574_v8 = vor.u32 %v2863_v59, %v2573_v58  ;;  %v2066_v12 = vor.u32 %v2733_v63, %v2063_v0  ;;  %v3346_v25 = vld [vmem:[#allocation1 + $0x24] sm:$0xff] }
  0x55   : > { %1554 = vmatpush.bf16.msrb.mxu3 %v2130_v19  ;;  %v2825_v3 = vld [vmem:[%s3168_s5 + $0x3e4] sm:$0xf]  ;;  %v2431_v5 = vld [vmem:[%s3168_s5 + $0x3f0] sm:$0xf0]  ;;  %v2306_v13 = vor.u32 %v2793_v1, %v2303_v2 }
  0x56   : > { %1516 = vmatpush.bf16.msrb.mxu0 %v2494_v26  ;;  %v2857_v6 = vld [vmem:[%s3168_s5 + $0x4e4] sm:$0xf]  ;;  %v2559_v7 = vld [vmem:[%s3168_s5 + $0x4f0] sm:$0xf0]  ;;  %v2434_v14 = vor.u32 %v2825_v3, %v2431_v5 }
  0x57   : > { %1529 = vmatpush.bf16.msrb.mxu1 %v2622_v30  ;;  %v2889_v10 = vld [vmem:[%s3168_s5 + $0x5e4] sm:$0xf]  ;;  %v2687_v11 = vld [vmem:[%s3168_s5 + $0x5f0] sm:$0xf0]  ;;  %v2562_v15 = vor.u32 %v2857_v6, %v2559_v7 }
  0x58   : > { %1542 = vmatpush.bf16.msrb.mxu2 %v1986_v31  ;;  %v2789_v16 = vld [vmem:[%s3168_s5 + $0x2c4] sm:$0xf]  ;;  %v2287_v17 = vld [vmem:[%s3168_s5 + $0x2d0] sm:$0xf0]  ;;  %v2690_v19 = vor.u32 %v2889_v10, %v2687_v11 }
  0x59   : > { %1555 = vmatpush.bf16.msrb.mxu3 %v2114_v35  ;;  %v2821_v18 = vld [vmem:[%s3168_s5 + $0x3c4] sm:$0xf]  ;;  %v2415_v20 = vld [vmem:[%s3168_s5 + $0x3d0] sm:$0xf0]  ;;  %v2290_v26 = vor.u32 %v2789_v16, %v2287_v17 }
  0x5a   : > { %1517 = vmatpush.bf16.msrb.mxu0 %v2478_v41  ;;  %v2853_v21 = vld [vmem:[%s3168_s5 + $0x4c4] sm:$0xf]  ;;  %v2543_v22 = vld [vmem:[%s3168_s5 + $0x4d0] sm:$0xf0]  ;;  %v2418_v31 = vor.u32 %v2821_v18, %v2415_v20 }
  0x5b   : > { %1530 = vmatpush.bf16.msrb.mxu1 %v2606_v42  ;;  %v2885_v23 = vld [vmem:[%s3168_s5 + $0x5c4] sm:$0xf]  ;;  %v2671_v24 = vld [vmem:[%s3168_s5 + $0x5d0] sm:$0xf0]  ;;  %v2546_v32 = vor.u32 %v2853_v21, %v2543_v22 }
  0x5c   : > { %1543 = vmatpush.bf16.msrb.mxu2 %v1970_v43  ;;  %v3348_v30 = vld [vmem:[#allocation1 + $0x2d] sm:$0xff]  ;;  %v2271_v35 = vld [vmem:[%s3168_s5 + $0x2b0] sm:$0xf0]  ;;  %v2674_v37 = vor.u32 %v2885_v23, %v2671_v24 }
  0x5d   : > { %1556 = vmatpush.bf16.msrb.mxu3 %v2098_v47  ;;  %v2785_v33 = vld [vmem:[%s3168_s5 + $0x2a4] sm:$0xf]  ;;  %v2399_v38 = vld [vmem:[%s3168_s5 + $0x3b0] sm:$0xf0] }
  0x5e   : > { %1518 = vmatpush.bf16.msrb.mxu0 %v2462_v53  ;;  %v2817_v36 = vld [vmem:[%s3168_s5 + $0x3a4] sm:$0xf]  ;;  %v2527_v40 = vld [vmem:[%s3168_s5 + $0x4b0] sm:$0xf0]  ;;  %v2274_v43 = vor.u32 %v2785_v33, %v2271_v35 }
  0x5f   : > { %1531 = vmatpush.bf16.msrb.mxu1 %v2590_v56  ;;  %v2849_v39 = vld [vmem:[%s3168_s5 + $0x4a4] sm:$0xf]  ;;  %v2655_v42 = vld [vmem:[%s3168_s5 + $0x5b0] sm:$0xf0]  ;;  %v2402_v44 = vor.u32 %v2817_v36, %v2399_v38 }
  0x60   : > { %1544 = vmatpush.bf16.msrb.mxu2 %v1954_v57  ;;  %v2881_v41 = vld [vmem:[%s3168_s5 + $0x5a4] sm:$0xf]  ;;  %v2530_v45 = vor.u32 %v2849_v39, %v2527_v40  ;;  %v2255_v47 = vld [vmem:[%s3168_s5 + $0x290] sm:$0xf0] }
  0x61   : > { %1557 = vmatpush.bf16.msrb.mxu3 %v2082_v61  ;;  %v2781_v46 = vld [vmem:[%s3168_s5 + $0x284] sm:$0xf]  ;;  %v2658_v49 = vor.u32 %v2881_v41, %v2655_v42  ;;  %v2383_v50 = vld [vmem:[%s3168_s5 + $0x390] sm:$0xf0] }
  0x62   : > { %1519 = vmatpush.bf16.msrb.mxu0 %v2446_v4  ;;  %v2813_v48 = vld [vmem:[%s3168_s5 + $0x384] sm:$0xf]  ;;  %v2511_v52 = vld [vmem:[%s3168_s5 + $0x490] sm:$0xf0]  ;;  %v2258_v55 = vor.u32 %v2781_v46, %v2255_v47  ;;  %v2732_v46 = vld [vmem:[%s3168_s5 + $0xf4] sm:$0xf0] }
  0x63   : > { %1532 = vmatpush.bf16.msrb.mxu1 %v2574_v8  ;;  %v2845_v51 = vld [vmem:[%s3168_s5 + $0x484] sm:$0xf]  ;;  %v2639_v54 = vld [vmem:[%s3168_s5 + $0x590] sm:$0xf0]  ;;  %v2386_v56 = vor.u32 %v2813_v48, %v2383_v50  ;;  %v2181_v47 = vld [vmem:[%s3168_s5 + $0x1e8] sm:$0xf] }
  0x64   : > { %1545 = vmatpush.bf16.msrb.mxu2 %v1938_v9  ;;  %v2877_v53 = vld [vmem:[%s3168_s5 + $0x584] sm:$0xf]  ;;  %v2514_v57 = vor.u32 %v2845_v51, %v2511_v52  ;;  %v2239_v59 = vld [vmem:[%s3168_s5 + $0x270] sm:$0xf0]  ;;  %v2309_v50 = vld [vmem:[%s3168_s5 + $0x2e8] sm:$0xf] }
  0x65   : > { %1558 = vmatpush.bf16.msrb.mxu3 %v2066_v12  ;;  %1520 = vmatmul.bf16.vlgmr.msrb.gmra.mxu0 %v3346_v25  ;;  %v2777_v58 = vld [vmem:[%s3168_s5 + $0x264] sm:$0xf]  ;;  %v2642_v61 = vor.u32 %v2877_v53, %v2639_v54  ;;  %v2367_v62 = vld [vmem:[%s3168_s5 + $0x370] sm:$0xf0]  ;;  %v2796_v51 = vld [vmem:[%s3168_s5 + $0x2f4] sm:$0xf0] }
  0x66   : > { %1564 = vmatpush.bf16.msra.mxu0 %v2306_v13  ;;  %1533 = vmatmul.bf16.vlgmr.msrb.gmra.mxu1 %v3348_v30  ;;  %v2809_v60 = vld [vmem:[%s3168_s5 + $0x364] sm:$0xf]  ;;  %v2495_v0 = vld [vmem:[%s3168_s5 + $0x470] sm:$0xf0]  ;;  %v2242_v3 = vor.u32 %v2777_v58, %v2239_v59  ;;  %v2437_v54 = vld [vmem:[%s3168_s5 + $0x3e8] sm:$0xf]  ;;  %v2310_v59 = vor.u32 %v2796_v51, %v2309_v50 }
  0x67   : > { %1577 = vmatpush.bf16.msra.mxu1 %v2434_v14  ;;  %1546 = vmatmul.bf16.vlgmr.msrb.gmra.mxu2 %v3297_v28  ;;  %v2841_v63 = vld [vmem:[%s3168_s5 + $0x464] sm:$0xf]  ;;  %v2623_v2 = vld [vmem:[%s3168_s5 + $0x570] sm:$0xf0]  ;;  %v2370_v4 = vor.u32 %v2809_v60, %v2367_v62  ;;  %v2037_v60 = vld [vmem:[%s3168_s5 + $0xc8] sm:$0xf] }
  0x68   : > { %1590 = vmatpush.bf16.msra.mxu2 %v2562_v15  ;;  %1559 = vmatmul.bf16.vlgmr.msrb.gmra.mxu3 %v3303_v34  ;;  %v2873_v1 = vld [vmem:[%s3168_s5 + $0x564] sm:$0xf]  ;;  %v2498_v5 = vor.u32 %v2841_v63, %v2495_v0  ;;  %v2223_v7 = vld [vmem:[%s3168_s5 + $0x250] sm:$0xf0]  ;;  %v2165_v62 = vld [vmem:[%s3168_s5 + $0x1c8] sm:$0xf] }
  0x69   : > { %1603 = vmatpush.bf16.msra.mxu3 %v2690_v19  ;;  %v2773_v6 = vld [vmem:[%s3168_s5 + $0x244] sm:$0xf]  ;;  %v2626_v9 = vor.u32 %v2873_v1, %v2623_v2  ;;  %v2351_v10 = vld [vmem:[%s3168_s5 + $0x350] sm:$0xf0]  ;;  %v2760_v0 = vld [vmem:[%s3168_s5 + $0x1d4] sm:$0xf0] }
  0x6a   : > { %1565 = vmatpush.bf16.msra.mxu0 %v2290_v26  ;;  %v2805_v8 = vld [vmem:[%s3168_s5 + $0x344] sm:$0xf]  ;;  %v2479_v12 = vld [vmem:[%s3168_s5 + $0x450] sm:$0xf0]  ;;  %v2226_v15 = vor.u32 %v2773_v6, %v2223_v7  ;;  %v2293_v1 = vld [vmem:[%s3168_s5 + $0x2c8] sm:$0xf]  ;;  %v2166_v6 = vor.u32 %v2760_v0, %v2165_v62 }
  0x6b   : > { %1578 = vmatpush.bf16.msra.mxu1 %v2418_v31  ;;  %v2837_v11 = vld [vmem:[%s3168_s5 + $0x444] sm:$0xf]  ;;  %v2607_v14 = vld [vmem:[%s3168_s5 + $0x550] sm:$0xf0]  ;;  %v2354_v16 = vor.u32 %v2805_v8, %v2351_v10  ;;  %v2792_v2 = vld [vmem:[%s3168_s5 + $0x2d4] sm:$0xf0] }
  0x6c   : > { %1591 = vmatpush.bf16.msra.mxu2 %v2546_v32  ;;  %v2869_v13 = vld [vmem:[%s3168_s5 + $0x544] sm:$0xf]  ;;  %v2482_v17 = vor.u32 %v2837_v11, %v2479_v12  ;;  %v2207_v19 = vld [vmem:[%s3168_s5 + $0x230] sm:$0xf0]  ;;  %v2294_v7 = vor.u32 %v2792_v2, %v2293_v1  ;;  %v2021_v8 = vld [vmem:[%s3168_s5 + $0xa8] sm:$0xf] }
  0x6d   : > { %1604 = vmatpush.bf16.msra.mxu3 %v2674_v37  ;;  %v2769_v18 = vld [vmem:[%s3168_s5 + $0x224] sm:$0xf]  ;;  %v2610_v21 = vor.u32 %v2869_v13, %v2607_v14  ;;  %v2335_v22 = vld [vmem:[%s3168_s5 + $0x330] sm:$0xf0]  ;;  %v2149_v10 = vld [vmem:[%s3168_s5 + $0x1a8] sm:$0xf] }
  0x6e   : > { %1566 = vmatpush.bf16.msra.mxu0 %v2274_v43  ;;  %v2801_v20 = vld [vmem:[%s3168_s5 + $0x324] sm:$0xf]  ;;  %v2463_v24 = vld [vmem:[%s3168_s5 + $0x430] sm:$0xf0]  ;;  %v2210_v32 = vor.u32 %v2769_v18, %v2207_v19  ;;  %v2756_v12 = vld [vmem:[%s3168_s5 + $0x1b4] sm:$0xf0] }
  0x6f   : > { %1579 = vmatpush.bf16.msra.mxu1 %v2402_v44  ;;  %v2833_v23 = vld [vmem:[%s3168_s5 + $0x424] sm:$0xf]  ;;  %v2591_v31 = vld [vmem:[%s3168_s5 + $0x530] sm:$0xf0]  ;;  %v2338_v36 = vor.u32 %v2801_v20, %v2335_v22  ;;  %v2277_v13 = vld [vmem:[%s3168_s5 + $0x2a8] sm:$0xf]  ;;  %v2150_v18 = vor.u32 %v2756_v12, %v2149_v10 }
  0x70   : > { %1592 = vmatpush.bf16.msra.mxu2 %v2530_v45  ;;  %v2865_v26 = vld [vmem:[%s3168_s5 + $0x524] sm:$0xf]  ;;  %v2191_v35 = vld [vmem:[%s3168_s5 + $0x210] sm:$0xf0]  ;;  %v2466_v37 = vor.u32 %v2833_v23, %v2463_v24  ;;  %v2053_v45 = vld [vmem:[%s3168_s5 + $0xe8] sm:$0xf] }
  0x71   : > { %1605 = vmatpush.bf16.msra.mxu3 %v2658_v49  ;;  %v2765_v33 = vld [vmem:[%s3168_s5 + $0x204] sm:$0xf]  ;;  %v2319_v39 = vld [vmem:[%s3168_s5 + $0x310] sm:$0xf0]  ;;  %v2594_v41 = vor.u32 %v2865_v26, %v2591_v31  ;;  %v2764_v49 = vld [vmem:[%s3168_s5 + $0x1f4] sm:$0xf0] }
  0x72   : > { %1567 = vmatpush.bf16.msra.mxu0 %v2258_v55  ;;  %v2797_v38 = vld [vmem:[%s3168_s5 + $0x304] sm:$0xf]  ;;  %v2447_v42 = vld [vmem:[%s3168_s5 + $0x410] sm:$0xf0]  ;;  %v2194_v48 = vor.u32 %v2765_v33, %v2191_v35  ;;  %v2828_v55 = vld [vmem:[%s3168_s5 + $0x3f4] sm:$0xf0]  ;;  %v2182_v58 = vor.u32 %v2764_v49, %v2181_v47 }
  0x73   : > { %1580 = vmatpush.bf16.msra.mxu1 %v2386_v56  ;;  %v2829_v40 = vld [vmem:[%s3168_s5 + $0x404] sm:$0xf]  ;;  %v2575_v44 = vld [vmem:[%s3168_s5 + $0x510] sm:$0xf0]  ;;  %v2322_v52 = vor.u32 %v2797_v38, %v2319_v39  ;;  %v2438_v63 = vor.u32 %v2828_v55, %v2437_v54  ;;  %v2788_v14 = vld [vmem:[%s3168_s5 + $0x2b4] sm:$0xf0] }
  0x74   : > { %1593 = vmatpush.bf16.msra.mxu2 %v2514_v57  ;;  %v2861_v43 = vld [vmem:[%s3168_s5 + $0x504] sm:$0xf]  ;;  %v2450_v53 = vor.u32 %v2829_v40, %v2447_v42  ;;  %v2054_v57 = vor.u32 %v2732_v46, %v2053_v45  ;;  %v2278_v19 = vor.u32 %v2788_v14, %v2277_v13  ;;  %v2005_v20 = vld [vmem:[%s3168_s5 + $0x88] sm:$0xf]  ;;  %v2752_v24 = vld [vmem:[%s3168_s5 + $0x194] sm:$0xf0] }
  0x75   : > { %1606 = vmatpush.bf16.msra.mxu3 %v2642_v61  ;;  %v2578_v56 = vor.u32 %v2861_v43, %v2575_v44  ;;  %v2728_v61 = vld [vmem:[%s3168_s5 + $0xd4] sm:$0xf0]  ;;  %v2133_v22 = vld [vmem:[%s3168_s5 + $0x188] sm:$0xf] }
  0x76   : > { %1568 = vmatpush.bf16.msra.mxu0 %v2242_v3  ;;  %v2421_v3 = vld [vmem:[%s3168_s5 + $0x3c8] sm:$0xf]  ;;  %v2784_v31 = vld [vmem:[%s3168_s5 + $0x294] sm:$0xf0] }
  0x77   : > { %1581 = vmatpush.bf16.msra.mxu1 %v2370_v4  ;;  %v2824_v4 = vld [vmem:[%s3168_s5 + $0x3d4] sm:$0xf0]  ;;  %v2261_v26 = vld [vmem:[%s3168_s5 + $0x288] sm:$0xf] }
  0x78   : > { %1594 = vmatpush.bf16.msra.mxu2 %v2498_v5  ;;  %v2038_v5 = vor.u32 %v2728_v61, %v2037_v60  ;;  %v2422_v11 = vor.u32 %v2824_v4, %v2421_v3  ;;  %v2816_v33 = vld [vmem:[%s3168_s5 + $0x394] sm:$0xf0]  ;;  %v1989_v38 = vld [vmem:[%s3168_s5 + $0x68] sm:$0xf] }
  0x79   : > { %1607 = vmatpush.bf16.msra.mxu3 %v2626_v9  ;;  %v2724_v9 = vld [vmem:[%s3168_s5 + $0xb4] sm:$0xf0]  ;;  %v2117_v40 = vld [vmem:[%s3168_s5 + $0x168] sm:$0xf] }
  0x7a   : > { %1569 = vmatpush.bf16.msra.mxu0 %v2226_v15  ;;  %v2405_v15 = vld [vmem:[%s3168_s5 + $0x3a8] sm:$0xf]  ;;  %v2716_v39 = vld [vmem:[%s3168_s5 + $0x74] sm:$0xf0] }
  0x7b   : > { %1582 = vmatpush.bf16.msra.mxu1 %v2354_v16  ;;  %v2820_v16 = vld [vmem:[%s3168_s5 + $0x3b4] sm:$0xf0]  ;;  %v2245_v43 = vld [vmem:[%s3168_s5 + $0x268] sm:$0xf]  ;;  %v1990_v47 = vor.u32 %v2716_v39, %v1989_v38 }
  0x7c   : > { %1595 = vmatpush.bf16.msra.mxu2 %v2482_v17  ;;  %v2022_v17 = vor.u32 %v2724_v9, %v2021_v8  ;;  %v2406_v23 = vor.u32 %v2820_v16, %v2405_v15  ;;  %v2748_v42 = vld [vmem:[%s3168_s5 + $0x174] sm:$0xf0]  ;;  %v2373_v45 = vld [vmem:[%s3168_s5 + $0x368] sm:$0xf] }
  0x7d   : > { %1608 = vmatpush.bf16.msra.mxu3 %v2610_v21  ;;  %v2720_v21 = vld [vmem:[%s3168_s5 + $0x94] sm:$0xf0]  ;;  %v1973_v50 = vld [vmem:[%s3168_s5 + $0x48] sm:$0xf] }
  0x7e   : > { %1570 = vmatpush.bf16.msra.mxu0 %v2210_v32  ;;  %v2389_v32 = vld [vmem:[%s3168_s5 + $0x388] sm:$0xf]  ;;  %v2006_v35 = vor.u32 %v2720_v21, %v2005_v20  ;;  %v2780_v44 = vld [vmem:[%s3168_s5 + $0x274] sm:$0xf0] }
  0x7f   : > { %1583 = vmatpush.bf16.msra.mxu1 %v2338_v36  ;;  %v2134_v36 = vor.u32 %v2752_v24, %v2133_v22  ;;  %v2812_v46 = vld [vmem:[%s3168_s5 + $0x374] sm:$0xf0]  ;;  %v2246_v49 = vor.u32 %v2780_v44, %v2245_v43  ;;  %v2229_v55 = vld [vmem:[%s3168_s5 + $0x248] sm:$0xf]  ;;  %v2730_v24 = vld [vmem:[%s3168_s5 + $0xec] sm:$0xf] }
  0x80   : > { %1596 = vmatpush.bf16.msra.mxu2 %v2466_v37  ;;  %v2262_v37 = vor.u32 %v2784_v31, %v2261_v26  ;;  %v2712_v51 = vld [vmem:[%s3168_s5 + $0x54] sm:$0xf0]  ;;  %v1957_v62 = vld [vmem:[%s3168_s5 + $0x28] sm:$0xf]  ;;  %v2055_v26 = vld [vmem:[%s3168_s5 + $0xf8] sm:$0xf0] }
  0x81   : > { %1609 = vmatpush.bf16.msra.mxu3 %v2594_v41  ;;  %v2390_v41 = vor.u32 %v2816_v33, %v2389_v32  ;;  %v2744_v54 = vld [vmem:[%s3168_s5 + $0x154] sm:$0xf0]  ;;  %v2085_v0 = vld [vmem:[%s3168_s5 + $0x128] sm:$0xf]  ;;  %v2762_v33 = vld [vmem:[%s3168_s5 + $0x1ec] sm:$0xf]  ;;  %v2058_v39 = vor.u32 %v2730_v24, %v2055_v26 }
  0x82   : > { %1571 = vmatpush.bf16.msra.mxu0 %v2194_v48  ;;  %v2118_v48 = vor.u32 %v2748_v42, %v2117_v40  ;;  %v2740_v2 = vld [vmem:[%s3168_s5 + $0x134] sm:$0xf0]  ;;  %v2213_v3 = vld [vmem:[%s3168_s5 + $0x228] sm:$0xf] }
  0x83   : > { %1584 = vmatpush.bf16.msra.mxu1 %v2322_v52  ;;  %v2101_v52 = vld [vmem:[%s3168_s5 + $0x148] sm:$0xf]  ;;  %v2772_v4 = vld [vmem:[%s3168_s5 + $0x234] sm:$0xf0]  ;;  %v2086_v10 = vor.u32 %v2740_v2, %v2085_v0 }
  0x84   : > { %1597 = vmatpush.bf16.msra.mxu2 %v2450_v53  ;;  %v2374_v53 = vor.u32 %v2812_v46, %v2373_v45  ;;  %v2102_v60 = vor.u32 %v2744_v54, %v2101_v52  ;;  %v1941_v8 = vld [vmem:[%s3168_s5 + $0x8] sm:$0xf]  ;;  %v2704_v9 = vld [vmem:[%s3168_s5 + $0x14] sm:$0xf0]  ;;  %v2726_v45 = vld [vmem:[%s3168_s5 + $0xcc] sm:$0xf] }
  0x85   : > { %1610 = vmatpush.bf16.msra.mxu3 %v2578_v56  ;;  %1572 = vmatmul.bf16.vlgmr.msra.gmra.mxu0 %v3295_v27  ;;  %v2776_v56 = vld [vmem:[%s3168_s5 + $0x254] sm:$0xf0]  ;;  %v2069_v12 = vld [vmem:[%s3168_s5 + $0x108] sm:$0xf]  ;;  %v1942_v22 = vor.u32 %v2704_v9, %v1941_v8  ;;  %v2039_v46 = vld [vmem:[%s3168_s5 + $0xd8] sm:$0xf0] }
  0x86   : > { %1616 = vmatpush.bf16.msrb.mxu0 %v2054_v57  ;;  %1585 = vmatmul.bf16.vlgmr.msra.gmra.mxu1 %v3299_v29  ;;  %v2357_v57 = vld [vmem:[%s3168_s5 + $0x348] sm:$0xf]  ;;  %v2230_v61 = vor.u32 %v2776_v56, %v2229_v55  ;;  %v2736_v13 = vld [vmem:[%s3168_s5 + $0x114] sm:$0xf0] }
  0x87   : > { %1629 = vmatpush.bf16.msrb.mxu1 %v2182_v58  ;;  %1598 = vmatmul.bf16.vlgmr.msra.gmra.mxu2 %v3346_v25  ;;  %v2808_v58 = vld [vmem:[%s3168_s5 + $0x354] sm:$0xf0]  ;;  %v2197_v14 = vld [vmem:[%s3168_s5 + $0x208] sm:$0xf]  ;;  %v2070_v31 = vor.u32 %v2736_v13, %v2069_v12 }
  0x88   : > { %1642 = vmatpush.bf16.msrb.mxu2 %v2310_v59  ;;  %1611 = vmatmul.bf16.vlgmr.msra.gmra.mxu3 %v3348_v30  ;;  %v1974_v59 = vor.u32 %v2712_v51, %v1973_v50  ;;  %v2358_v1 = vor.u32 %v2808_v58, %v2357_v57  ;;  %v2768_v16 = vld [vmem:[%s3168_s5 + $0x214] sm:$0xf0]  ;;  %v2693_v21 = vld [vmem:[%s3168_s5 + $0x5e8] sm:$0xf]  ;;  %v2042_v51 = vor.u32 %v2726_v45, %v2039_v46  ;;  %v2722_v57 = vld [vmem:[%s3168_s5 + $0xac] sm:$0xf] }
  0x89   : > { %1655 = vmatpush.bf16.msrb.mxu3 %v2438_v63  ;;  %v2708_v63 = vld [vmem:[%s3168_s5 + $0x34] sm:$0xf0]  ;;  %v2198_v32 = vor.u32 %v2768_v16, %v2197_v14  ;;  %v2549_v40 = vld [vmem:[%s3168_s5 + $0x4c8] sm:$0xf]  ;;  %v2023_v58 = vld [vmem:[%s3168_s5 + $0xb8] sm:$0xf0] }
  0x8a   : > { %1617 = vmatpush.bf16.msrb.mxu0 %v2038_v5  ;;  %v2341_v5 = vld [vmem:[%s3168_s5 + $0x328] sm:$0xf]  ;;  %v2860_v20 = vld [vmem:[%s3168_s5 + $0x4f4] sm:$0xf0]  ;;  %v1991_v16 = vld [vmem:[%s3168_s5 + $0x78] sm:$0xf0] }
  0x8b   : > { %1630 = vmatpush.bf16.msrb.mxu1 %v2166_v6  ;;  %v2804_v6 = vld [vmem:[%s3168_s5 + $0x334] sm:$0xf0]  ;;  %v2677_v42 = vld [vmem:[%s3168_s5 + $0x5c8] sm:$0xf]  ;;  %v2706_v45 = vld [vmem:[%s3168_s5 + $0x2c] sm:$0xf] }
  0x8c   : > { %1643 = vmatpush.bf16.msrb.mxu2 %v2294_v7  ;;  %v1958_v7 = vor.u32 %v2708_v63, %v1957_v62  ;;  %v2342_v15 = vor.u32 %v2804_v6, %v2341_v5  ;;  %v2888_v44 = vld [vmem:[%s3168_s5 + $0x5d4] sm:$0xf0]  ;;  %v2533_v52 = vld [vmem:[%s3168_s5 + $0x4a8] sm:$0xf]  ;;  %v2026_v63 = vor.u32 %v2722_v57, %v2023_v58  ;;  %v2750_v5 = vld [vmem:[%s3168_s5 + $0x18c] sm:$0xf] }
  0x8d   : > { %1656 = vmatpush.bf16.msrb.mxu3 %v2422_v11  ;;  %v2214_v11 = vor.u32 %v2772_v4, %v2213_v3  ;;  %v2678_v50 = vor.u32 %v2888_v44, %v2677_v42  ;;  %v2661_v54 = vld [vmem:[%s3168_s5 + $0x5a8] sm:$0xf]  ;;  %v2884_v56 = vld [vmem:[%s3168_s5 + $0x5b4] sm:$0xf0]  ;;  %v2007_v4 = vld [vmem:[%s3168_s5 + $0x98] sm:$0xf0] }
  0x8e   : > { %1618 = vmatpush.bf16.msrb.mxu0 %v2022_v17  ;;  %v2325_v17 = vld [vmem:[%s3168_s5 + $0x308] sm:$0xf]  ;;  %v2662_v62 = vor.u32 %v2884_v56, %v2661_v54  ;;  %v2848_v0 = vld [vmem:[%s3168_s5 + $0x494] sm:$0xf0]  ;;  %v2135_v6 = vld [vmem:[%s3168_s5 + $0x198] sm:$0xf0] }
  0x8f   : > { %1631 = vmatpush.bf16.msrb.mxu1 %v2150_v18  ;;  %v2800_v18 = vld [vmem:[%s3168_s5 + $0x314] sm:$0xf0]  ;;  %v2629_v12 = vld [vmem:[%s3168_s5 + $0x568] sm:$0xf]  ;;  %v2138_v13 = vor.u32 %v2750_v5, %v2135_v6  ;;  %v1959_v46 = vld [vmem:[%s3168_s5 + $0x38] sm:$0xf0] }
  0x90   : > { %1644 = vmatpush.bf16.msrb.mxu2 %v2278_v19  ;;  %v2565_v19 = vld [vmem:[%s3168_s5 + $0x4e8] sm:$0xf]  ;;  %v2880_v3 = vld [vmem:[%s3168_s5 + $0x594] sm:$0xf0]  ;;  %v2702_v56 = vld [vmem:[%s3168_s5 + $0xc] sm:$0xf] }
  0x91   : > { %1657 = vmatpush.bf16.msrb.mxu3 %v2406_v23  ;;  %v2892_v23 = vld [vmem:[%s3168_s5 + $0x5f4] sm:$0xf0]  ;;  %v2613_v24 = vld [vmem:[%s3168_s5 + $0x548] sm:$0xf]  ;;  %v1943_v58 = vld [vmem:[%s3168_s5 + $0x18] sm:$0xf0] }
  0x92   : > { %1619 = vmatpush.bf16.msrb.mxu0 %v2006_v35  ;;  %v2183_v35 = vld [vmem:[%s3168_s5 + $0x1f8] sm:$0xf0]  ;;  %v2694_v38 = vor.u32 %v2892_v23, %v2693_v21  ;;  %v2876_v14 = vld [vmem:[%s3168_s5 + $0x574] sm:$0xf0]  ;;  %v2597_v42 = vld [vmem:[%s3168_s5 + $0x528] sm:$0xf] }
  0x93   : > { %1632 = vmatpush.bf16.msrb.mxu1 %v2134_v36  ;;  %v2326_v36 = vor.u32 %v2800_v18, %v2325_v17  ;;  %v2186_v43 = vor.u32 %v2762_v33, %v2183_v35  ;;  %v2746_v17 = vld [vmem:[%s3168_s5 + $0x16c] sm:$0xf]  ;;  %v2119_v18 = vld [vmem:[%s3168_s5 + $0x178] sm:$0xf0]  ;;  %v2840_v23 = vld [vmem:[%s3168_s5 + $0x454] sm:$0xf0] }
  0x94   : > { %1645 = vmatpush.bf16.msrb.mxu2 %v2262_v37  ;;  %v2566_v37 = vor.u32 %v2860_v20, %v2565_v19  ;;  %v2630_v20 = vor.u32 %v2876_v14, %v2629_v12  ;;  %v2122_v26 = vor.u32 %v2746_v17, %v2119_v18  ;;  %v1975_v33 = vld [vmem:[%s3168_s5 + $0x58] sm:$0xf0]  ;;  %v2742_v35 = vld [vmem:[%s3168_s5 + $0x14c] sm:$0xf]  ;;  %v2868_v44 = vld [vmem:[%s3168_s5 + $0x534] sm:$0xf0] }
  0x95   : > { %1658 = vmatpush.bf16.msrb.mxu3 %v2390_v41  ;;  %v2856_v41 = vld [vmem:[%s3168_s5 + $0x4d4] sm:$0xf0]  ;;  %v2581_v54 = vld [vmem:[%s3168_s5 + $0x508] sm:$0xf]  ;;  %v2695_v5 = vld [vmem:[%s3168_s5 + $0x5f8] sm:$0xf0] }
  0x96   : > { %1620 = vmatpush.bf16.msrb.mxu0 %v1990_v47  ;;  %v2758_v47 = vld [vmem:[%s3168_s5 + $0x1cc] sm:$0xf]  ;;  %v2423_v14 = vld [vmem:[%s3168_s5 + $0x3d8] sm:$0xf0] }
  0x97   : > { %1633 = vmatpush.bf16.msrb.mxu1 %v2118_v48  ;;  %v2167_v48 = vld [vmem:[%s3168_s5 + $0x1d8] sm:$0xf0]  ;;  %v2822_v12 = vld [vmem:[%s3168_s5 + $0x3cc] sm:$0xf] }
  0x98   : > { %1646 = vmatpush.bf16.msrb.mxu2 %v2246_v49  ;;  %v2550_v49 = vor.u32 %v2856_v41, %v2549_v40  ;;  %v2170_v55 = vor.u32 %v2758_v47, %v2167_v48  ;;  %v2469_v40 = vld [vmem:[%s3168_s5 + $0x428] sm:$0xf]  ;;  %v2836_v41 = vld [vmem:[%s3168_s5 + $0x434] sm:$0xf0]  ;;  %v2738_v47 = vld [vmem:[%s3168_s5 + $0x12c] sm:$0xf] }
  0x99   : > { %1659 = vmatpush.bf16.msrb.mxu3 %v2374_v53  ;;  %v2852_v53 = vld [vmem:[%s3168_s5 + $0x4b4] sm:$0xf0]  ;;  %v2087_v48 = vld [vmem:[%s3168_s5 + $0x138] sm:$0xf0]  ;;  %v2886_v17 = vld [vmem:[%s3168_s5 + $0x5cc] sm:$0xf] }
  0x9a   : > { %1621 = vmatpush.bf16.msrb.mxu0 %v1974_v59  ;;  %v2754_v59 = vld [vmem:[%s3168_s5 + $0x1ac] sm:$0xf]  ;;  %v2090_v57 = vor.u32 %v2738_v47, %v2087_v48  ;;  %v2679_v18 = vld [vmem:[%s3168_s5 + $0x5d8] sm:$0xf0] }
  0x9b   : > { %1634 = vmatpush.bf16.msrb.mxu1 %v2102_v60  ;;  %v2151_v60 = vld [vmem:[%s3168_s5 + $0x1b8] sm:$0xf0]  ;;  %v2778_v48 = vld [vmem:[%s3168_s5 + $0x26c] sm:$0xf] }
  0x9c   : > { %1647 = vmatpush.bf16.msrb.mxu2 %v2230_v61  ;;  %v2534_v61 = vor.u32 %v2852_v53, %v2533_v52  ;;  %v2154_v2 = vor.u32 %v2754_v59, %v2151_v60  ;;  %v2598_v52 = vor.u32 %v2868_v44, %v2597_v42  ;;  %v1962_v53 = vor.u32 %v2706_v45, %v1959_v46  ;;  %v2734_v59 = vld [vmem:[%s3168_s5 + $0x10c] sm:$0xf]  ;;  %v2071_v60 = vld [vmem:[%s3168_s5 + $0x118] sm:$0xf0] }
  0x9d   : > { %1660 = vmatpush.bf16.msrb.mxu3 %v2358_v1  ;;  %v2645_v1 = vld [vmem:[%s3168_s5 + $0x588] sm:$0xf]  ;;  %v2074_v6 = vor.u32 %v2734_v59, %v2071_v60  ;;  %v2391_v42 = vld [vmem:[%s3168_s5 + $0x398] sm:$0xf0]  ;;  %v2878_v44 = vld [vmem:[%s3168_s5 + $0x58c] sm:$0xf] }
  0x9e   : > { %1622 = vmatpush.bf16.msrb.mxu0 %v1958_v7  ;;  %v2646_v8 = vor.u32 %v2880_v3, %v2645_v1  ;;  %v2858_v1 = vld [vmem:[%s3168_s5 + $0x4ec] sm:$0xf] }
  0x9f   : > { %1635 = vmatpush.bf16.msrb.mxu1 %v2086_v10  ;;  %v2501_v10 = vld [vmem:[%s3168_s5 + $0x468] sm:$0xf] }
  0xa0   : > { %1648 = vmatpush.bf16.msrb.mxu2 %v2214_v11  ;;  %v2844_v11 = vld [vmem:[%s3168_s5 + $0x474] sm:$0xf0] }
  0xa1   : > { %1661 = vmatpush.bf16.msrb.mxu3 %v2342_v15  ;;  %v2714_v15 = vld [vmem:[%s3168_s5 + $0x6c] sm:$0xf]  ;;  %v2502_v19 = vor.u32 %v2844_v11, %v2501_v10  ;;  %v2295_v11 = vld [vmem:[%s3168_s5 + $0x2d8] sm:$0xf0] }
  0xa2   : > { %1623 = vmatpush.bf16.msrb.mxu0 %v1942_v22  ;;  %v1994_v21 = vor.u32 %v2714_v15, %v1991_v16  ;;  %v2485_v22 = vld [vmem:[%s3168_s5 + $0x448] sm:$0xf]  ;;  %v2790_v10 = vld [vmem:[%s3168_s5 + $0x2cc] sm:$0xf]  ;;  %v2551_v16 = vld [vmem:[%s3168_s5 + $0x4d8] sm:$0xf0] }
  0xa3   : > { %1636 = vmatpush.bf16.msrb.mxu1 %v2070_v31  ;;  %v2872_v31 = vld [vmem:[%s3168_s5 + $0x554] sm:$0xf0]  ;;  %v2854_v15 = vld [vmem:[%s3168_s5 + $0x4cc] sm:$0xf] }
  0xa4   : > { %1649 = vmatpush.bf16.msrb.mxu2 %v2198_v32  ;;  %v2710_v32 = vld [vmem:[%s3168_s5 + $0x4c] sm:$0xf] }
  0xa5   : > { %1662 = vmatpush.bf16.msrb.mxu3 %v2326_v36  ;;  %1624 = vmatmul.bf16.vlgmr.msrb.gmra.mxu0 %v3297_v28  ;;  %v2103_v36 = vld [vmem:[%s3168_s5 + $0x158] sm:$0xf0] }
  0xa6   : > { %1668 = vmatpush.bf16.msra.mxu0 %v2566_v37  ;;  %1637 = vmatmul.bf16.vlgmr.msrb.gmra.mxu1 %v3303_v34  ;;  %v2486_v37 = vor.u32 %v2840_v23, %v2485_v22  ;;  %v2786_v22 = vld [vmem:[%s3168_s5 + $0x2ac] sm:$0xf]  ;;  %v2279_v23 = vld [vmem:[%s3168_s5 + $0x2b8] sm:$0xf0] }
  0xa7   : > { %1681 = vmatpush.bf16.msra.mxu1 %v2694_v38  ;;  %1650 = vmatmul.bf16.vlgmr.msrb.gmra.mxu2 %v3295_v27  ;;  %v2517_v27 = vld [vmem:[%s3168_s5 + $0x488] sm:$0xf]  ;;  %v2614_v38 = vor.u32 %v2872_v31, %v2613_v24  ;;  %v2818_v24 = vld [vmem:[%s3168_s5 + $0x3ac] sm:$0xf]  ;;  %v2407_v31 = vld [vmem:[%s3168_s5 + $0x3b8] sm:$0xf0] }
  0xa8   : > { %1694 = vmatpush.bf16.msra.mxu2 %v2058_v39  ;;  %1663 = vmatmul.bf16.vlgmr.msrb.gmra.mxu3 %v3299_v29  ;;  %v2718_v29 = vld [vmem:[%s3168_s5 + $0x8c] sm:$0xf]  ;;  %v2518_v7 = vor.u32 %v2848_v0, %v2517_v27  ;;  %v1978_v39 = vor.u32 %v2710_v32, %v1975_v33  ;;  %v2439_v0 = vld [vmem:[%s3168_s5 + $0x3f8] sm:$0xf0] }
  0xa9   : > { %1707 = vmatpush.bf16.msra.mxu3 %v2186_v43  ;;  %v2010_v9 = vor.u32 %v2718_v29, %v2007_v4  ;;  %v2106_v43 = vor.u32 %v2742_v35, %v2103_v36  ;;  %v1946_v29 = vor.u32 %v2702_v56, %v1943_v58  ;;  %v2890_v4 = vld [vmem:[%s3168_s5 + $0x5ec] sm:$0xf]  ;;  %v2535_v33 = vld [vmem:[%s3168_s5 + $0x4b8] sm:$0xf0] }
  0xaa   : > { %1669 = vmatpush.bf16.msra.mxu0 %v2550_v49  ;;  %v2470_v49 = vor.u32 %v2836_v41, %v2469_v40  ;;  %v2850_v32 = vld [vmem:[%s3168_s5 + $0x4ac] sm:$0xf]  ;;  %v2663_v36 = vld [vmem:[%s3168_s5 + $0x5b8] sm:$0xf0] }
  0xab   : > { %1682 = vmatpush.bf16.msra.mxu1 %v2678_v50  ;;  %v2453_v50 = vld [vmem:[%s3168_s5 + $0x408] sm:$0xf]  ;;  %v2882_v35 = vld [vmem:[%s3168_s5 + $0x5ac] sm:$0xf]  ;;  %v2263_v40 = vld [vmem:[%s3168_s5 + $0x298] sm:$0xf0] }
  0xac   : > { %1695 = vmatpush.bf16.msra.mxu2 %v2042_v51  ;;  %v2832_v51 = vld [vmem:[%s3168_s5 + $0x414] sm:$0xf0]  ;;  %v2814_v41 = vld [vmem:[%s3168_s5 + $0x38c] sm:$0xf]  ;;  %v2631_v56 = vld [vmem:[%s3168_s5 + $0x578] sm:$0xf0] }
  0xad   : > { %1708 = vmatpush.bf16.msra.mxu3 %v2170_v55  ;;  %v2864_v55 = vld [vmem:[%s3168_s5 + $0x514] sm:$0xf0]  ;;  %v2454_v27 = vor.u32 %v2832_v51, %v2453_v50  ;;  %v2394_v46 = vor.u32 %v2814_v41, %v2391_v42  ;;  %v2810_v50 = vld [vmem:[%s3168_s5 + $0x36c] sm:$0xf] }
  0xae   : > { %1670 = vmatpush.bf16.msra.mxu0 %v2534_v61  ;;  %v2794_v61 = vld [vmem:[%s3168_s5 + $0x2ec] sm:$0xf]  ;;  %v2582_v3 = vor.u32 %v2864_v55, %v2581_v54  ;;  %v2503_v54 = vld [vmem:[%s3168_s5 + $0x478] sm:$0xf0] }
  0xaf   : > { %1683 = vmatpush.bf16.msra.mxu1 %v2662_v62  ;;  %v2311_v62 = vld [vmem:[%s3168_s5 + $0x2f8] sm:$0xf0]  ;;  %v2874_v55 = vld [vmem:[%s3168_s5 + $0x56c] sm:$0xf] }
  0xb0   : > { %1696 = vmatpush.bf16.msra.mxu2 %v2026_v63  ;;  %v2826_v63 = vld [vmem:[%s3168_s5 + $0x3ec] sm:$0xf] }
  0xb1   : > { %1709 = vmatpush.bf16.msra.mxu3 %v2154_v2  ;;  %v2567_v2 = vld [vmem:[%s3168_s5 + $0x4f8] sm:$0xf0]  ;;  %v2774_v58 = vld [vmem:[%s3168_s5 + $0x24c] sm:$0xf] }
  0xb2   : > { %1671 = vmatpush.bf16.msra.mxu0 %v2518_v7  ;;  %v2314_v7 = vor.u32 %v2794_v61, %v2311_v62  ;;  %v2231_v61 = vld [vmem:[%s3168_s5 + $0x258] sm:$0xf0]  ;;  %v2806_v62 = vld [vmem:[%s3168_s5 + $0x34c] sm:$0xf] }
  0xb3   : > { %1684 = vmatpush.bf16.msra.mxu1 %v2646_v8  ;;  %v2442_v8 = vor.u32 %v2826_v63, %v2439_v0  ;;  %v2359_v63 = vld [vmem:[%s3168_s5 + $0x358] sm:$0xf0]  ;;  %v2838_v0 = vld [vmem:[%s3168_s5 + $0x44c] sm:$0xf] }
  0xb4   : > { %1697 = vmatpush.bf16.msra.mxu2 %v2010_v9  ;;  %v2570_v9 = vor.u32 %v2858_v1, %v2567_v2  ;;  %v2487_v1 = vld [vmem:[%s3168_s5 + $0x458] sm:$0xf0]  ;;  %v3589_v2 = vld [vmem:[%s3174_s8] sm:$0xf] }
  0xb5   : > { %1710 = vmatpush.bf16.msra.mxu3 %v2138_v13  ;;  %v2698_v13 = vor.u32 %v2890_v4, %v2695_v5  ;;  %v2234_v4 = vor.u32 %v2774_v58, %v2231_v61  ;;  %v2770_v5 = vld [vmem:[%s3168_s5 + $0x22c] sm:$0xf] }
  0xb6   : > { %1672 = vmatpush.bf16.msra.mxu0 %v2502_v19  ;;  %v2298_v19 = vor.u32 %v2790_v10, %v2295_v11  ;;  %v478_v10 = vperm.slane %v3589_v2, 0 }
  0xb7   : > { %1685 = vmatpush.bf16.msra.mxu1 %v2630_v20  ;;  %v2426_v20 = vor.u32 %v2822_v12, %v2423_v14  ;;  %v2343_v12 = vld [vmem:[%s3168_s5 + $0x338] sm:$0xf0] }
  0xb8   : > { %1698 = vmatpush.bf16.msra.mxu2 %v1994_v21  ;;  %v2554_v21 = vor.u32 %v2854_v15, %v2551_v16  ;;  %v2471_v14 = vld [vmem:[%s3168_s5 + $0x438] sm:$0xf0]  ;;  %v2866_v15 = vld [vmem:[%s3168_s5 + $0x52c] sm:$0xf] }
  0xb9   : > { %1711 = vmatpush.bf16.msra.mxu3 %v2122_v26  ;;  %v2682_v26 = vor.u32 %v2886_v17, %v2679_v18  ;;  %v2599_v16 = vld [vmem:[%s3168_s5 + $0x538] sm:$0xf0] }
  0xba   : > { %1673 = vmatpush.bf16.msra.mxu0 %v2486_v37  ;;  %v2282_v37 = vor.u32 %v2786_v22, %v2279_v23  ;;  %v2199_v22 = vld [vmem:[%s3168_s5 + $0x218] sm:$0xf0]  ;;  %v2798_v23 = vld [vmem:[%s3168_s5 + $0x30c] sm:$0xf] }
  0xbb   : > { %1686 = vmatpush.bf16.msra.mxu1 %v2614_v38  ;;  %v2538_v38 = vor.u32 %v2850_v32, %v2535_v33  ;;  %v2327_v32 = vld [vmem:[%s3168_s5 + $0x318] sm:$0xf0]  ;;  %v2830_v33 = vld [vmem:[%s3168_s5 + $0x40c] sm:$0xf] }
  0xbc   : > { %1699 = vmatpush.bf16.msra.mxu2 %v1978_v39  ;;  %v2782_v39 = vld [vmem:[%s3168_s5 + $0x28c] sm:$0xf] }
  0xbd   : > { %1712 = vmatpush.bf16.msra.mxu3 %v2106_v43  ;;  %v2519_v43 = vld [vmem:[%s3168_s5 + $0x498] sm:$0xf0]  ;;  %v2266_v45 = vor.u32 %v2782_v39, %v2263_v40  ;;  %v2330_v39 = vor.u32 %v2798_v23, %v2327_v32  ;;  %v480_v32 = vperm.slane %v3589_v2, 2 }
  0xbe   : > { %1674 = vmatpush.bf16.msra.mxu0 %v2470_v49  ;;  %v2247_v49 = vld [vmem:[%s3168_s5 + $0x278] sm:$0xf0] }
  0xbf   : > { %1687 = vmatpush.bf16.msra.mxu1 %v2598_v52  ;;  %v2375_v52 = vld [vmem:[%s3168_s5 + $0x378] sm:$0xf0] }
  0xc0   : > { %1700 = vmatpush.bf16.msra.mxu2 %v1962_v53  ;;  %v2842_v53 = vld [vmem:[%s3168_s5 + $0x46c] sm:$0xf]  ;;  %v2378_v59 = vor.u32 %v2810_v50, %v2375_v52 }
  0xc1   : > { %1713 = vmatpush.bf16.msra.mxu3 %v2090_v57  ;;  %v2250_v57 = vor.u32 %v2778_v48, %v2247_v49  ;;  %v2506_v60 = vor.u32 %v2842_v53, %v2503_v54  ;;  %v2962_v48 = vld [vmem:[#allocation1 + $0x2d] sm:$0xff] }
  0xc2   : > { %1675 = vmatpush.bf16.msra.mxu0 %v2454_v27  ;;  %v2634_v27 = vor.u32 %v2874_v55, %v2631_v56  ;;  %v479_v55 = vperm.slane %v3589_v2, 1 }
  0xc3   : > { %1688 = vmatpush.bf16.msra.mxu1 %v2582_v3  ;;  %v2870_v3 = vld [vmem:[%s3168_s5 + $0x54c] sm:$0xf] }
  0xc4   : > { %1701 = vmatpush.bf16.msra.mxu2 %v1946_v29  ;;  %v2615_v29 = vld [vmem:[%s3168_s5 + $0x558] sm:$0xf0]  ;;  %v1469_v18 = vpop.f32.mrf.mxu0 }
  0xc5   : > { %1714 = vmatpush.bf16.msra.mxu3 %v2074_v6  ;;  %1676 = vmatmul.bf16.vlgmr.msra.gmra.mxu0 %v3346_v25  ;;  %v2666_v25 = vor.u32 %v2882_v35, %v2663_v36  ;;  %v2362_v6 = vor.u32 %v2806_v62, %v2359_v63  ;;  %v2618_v11 = vor.u32 %v2870_v3, %v2615_v29  ;;  %v2455_v35 = vld [vmem:[%s3168_s5 + $0x418] sm:$0xf0]  ;;  %v2862_v36 = vld [vmem:[%s3168_s5 + $0x50c] sm:$0xf] }
  0xc6   : > { %1720 = vmatpush.bf16.msrb.mxu0 %v2314_v7  ;;  %1689 = vmatmul.bf16.vlgmr.msra.gmra.mxu1 %v3348_v30  ;;  %v2647_v30 = vld [vmem:[%s3168_s5 + $0x598] sm:$0xf0]  ;;  %v2490_v7 = vor.u32 %v2838_v0, %v2487_v1  ;;  %v2458_v40 = vor.u32 %v2830_v33, %v2455_v35 }
  0xc7   : > { %1733 = vmatpush.bf16.msrb.mxu1 %v2442_v8  ;;  %1702 = vmatmul.bf16.vlgmr.msra.gmra.mxu2 %v3297_v28  ;;  %v2410_v28 = vor.u32 %v2818_v24, %v2407_v31  ;;  %v2650_v51 = vor.u32 %v2878_v44, %v2647_v30  ;;  %v2215_v8 = vld [vmem:[%s3168_s5 + $0x238] sm:$0xf0]  ;;  %v1470_v24 = vadd.f32 %v1469_v18, %v478_v10 }
  0xc8   : > { %1746 = vmatpush.bf16.msrb.mxu2 %v2570_v9  ;;  %1715 = vmatmul.bf16.vlgmr.msra.gmra.mxu3 %v3303_v34  ;;  %v2846_v34 = vld [vmem:[%s3168_s5 + $0x48c] sm:$0xf]  ;;  %v2218_v17 = vor.u32 %v2770_v5, %v2215_v8  ;;  %v2602_v31 = vor.u32 %v2866_v15, %v2599_v16 }
  0xc9   : > { %1759 = vmatpush.bf16.msrb.mxu3 %v2698_v13  ;;  %v2522_v47 = vor.u32 %v2846_v34, %v2519_v43  ;;  %v2802_v9 = vld [vmem:[%s3168_s5 + $0x32c] sm:$0xf] }
  0xca   : > { %1721 = vmatpush.bf16.msrb.mxu0 %v2298_v19  ;;  %v2834_v13 = vld [vmem:[%s3168_s5 + $0x42c] sm:$0xf]  ;;  %v2346_v19 = vor.u32 %v2802_v9, %v2343_v12 }
  0xcb   : > { %1734 = vmatpush.bf16.msrb.mxu1 %v2426_v20  ;;  %v2474_v20 = vor.u32 %v2834_v13, %v2471_v14 }
  0xcc   : > { %1747 = vmatpush.bf16.msrb.mxu2 %v2554_v21  ;;  %v2766_v21 = vld [vmem:[%s3168_s5 + $0x20c] sm:$0xf]  ;;  %v1471_v44 = vpop.f32.mrf.mxu0 }
  0xcd   : > { %1760 = vmatpush.bf16.msrb.mxu3 %v2682_v26  ;;  %v1482_v26 = vpop.f32.mrf.mxu1 }
  0xce   : > { %1722 = vmatpush.bf16.msrb.mxu0 %v2282_v37  ;;  %v2583_v37 = vld [vmem:[%s3168_s5 + $0x518] sm:$0xf0] }
  0xcf   : > { %1735 = vmatpush.bf16.msrb.mxu1 %v2410_v28  ;;  %v1483_v28 = vadd.f32 %v1482_v26, %v1470_v24 }
  0xd0   : > { %1748 = vmatpush.bf16.msrb.mxu2 %v2538_v38  ;;  %v2202_v38 = vor.u32 %v2766_v21, %v2199_v22 }
  0xd1   : > { %1761 = vmatpush.bf16.msrb.mxu3 %v2666_v25  ;;  %v1495_v41 = vpop.f32.mrf.mxu2  ;;  %v2586_v25 = vor.u32 %v2862_v36, %v2583_v37  ;;  %v481_v36 = vperm.slane %v3589_v2, 3 }
  0xd2   : > { %1723 = vmatpush.bf16.msrb.mxu0 %v2266_v45  ;;  %v1496_v42 = vadd.f32 %v1495_v41, %v1483_v28  ;;  %v1508_v34 = vpop.f32.mrf.mxu3  ;;  %v2959_v45 = vld [vmem:[#allocation1 + $0x12] sm:$0xff] }
  0xd3   : > { %1736 = vmatpush.bf16.msrb.mxu1 %v2394_v46  ;;  %v2960_v46 = vld [vmem:[#allocation1 + $0x1b] sm:$0xff] }
  0xd4   : > { %1749 = vmatpush.bf16.msrb.mxu2 %v2522_v47  ;;  %v1509_v43 = vadd.f32 %v1508_v34, %v1496_v42  ;;  %v2961_v47 = vld [vmem:[#allocation1 + $0x24] sm:$0xff] }
  0xd5   : > { %1762 = vmatpush.bf16.msrb.mxu3 %v2650_v51  ;;  %v1484_v30 = vpop.f32.mrf.mxu1 }
  0xd6   : > { %1724 = vmatpush.bf16.msrb.mxu0 %v2250_v57 }
  0xd7   : > { %1737 = vmatpush.bf16.msrb.mxu1 %v2378_v59 }
  0xd8   : > { %1750 = vmatpush.bf16.msrb.mxu2 %v2506_v60 }
  0xd9   : > { %1763 = vmatpush.bf16.msrb.mxu3 %v2634_v27  ;;  %v1497_v49 = vpop.f32.mrf.mxu2 }
  0xda   : > { %1725 = vmatpush.bf16.msrb.mxu0 %v2234_v4  ;;  %v1510_v50 = vpop.f32.mrf.mxu3 }
  0xdb   : > { %1738 = vmatpush.bf16.msrb.mxu1 %v2362_v6 }
  0xdc   : > { %1751 = vmatpush.bf16.msrb.mxu2 %v2490_v7 }
  0xdd   : > { %1764 = vmatpush.bf16.msrb.mxu3 %v2618_v11 }
  0xde   : > { %1726 = vmatpush.bf16.msrb.mxu0 %v2218_v17 }
  0xdf   : > { %1739 = vmatpush.bf16.msrb.mxu1 %v2346_v19 }
  0xe0   : > { %1752 = vmatpush.bf16.msrb.mxu2 %v2474_v20 }
  0xe1   : > { %1765 = vmatpush.bf16.msrb.mxu3 %v2602_v31 }
  0xe2   : > { %1727 = vmatpush.bf16.msrb.mxu0 %v2202_v38  ;;  %v1521_v51 = vpop.f32.mrf.mxu0 }
  0xe3   : > { %1740 = vmatpush.bf16.msrb.mxu1 %v2330_v39  ;;  %v1522_v52 = vadd.f32 %v1521_v51, %v1509_v43  ;;  %v1534_v53 = vpop.f32.mrf.mxu1 }
  0xe4   : > { %1753 = vmatpush.bf16.msrb.mxu2 %v2458_v40 }
  0xe5   : > { %1766 = vmatpush.bf16.msrb.mxu3 %v2586_v25  ;;  %1728 = vmatmul.bf16.vlgmr.msrb.gmra.mxu0 %v2959_v45  ;;  %v1535_v54 = vadd.f32 %v1534_v53, %v1522_v52 }
  0xe6   : > { %1741 = vmatmul.bf16.vlgmr.msrb.gmra.mxu1 %v2960_v46 }
  0xe7   : > { %1754 = vmatmul.bf16.vlgmr.msrb.gmra.mxu2 %v2961_v47 }
  0xe8   : > { %1767 = vmatmul.bf16.vlgmr.msrb.gmra.mxu3 %v2962_v48 }
  0xea   : > { %v1547_v56 = vpop.f32.mrf.mxu2  ;;  %v1523_v59 = vpop.f32.mrf.mxu0 }
  0xeb   : > { %v1548_v57 = vadd.f32 %v1547_v56, %v479_v55  ;;  %v1560_v58 = vpop.f32.mrf.mxu3  ;;  %v1536_v60 = vpop.f32.mrf.mxu1 }
  0xed   : > { %v1561_v61 = vadd.f32 %v1560_v58, %v1548_v57 }
  0xf2   : > { %v1549_v62 = vpop.f32.mrf.mxu2 }
  0xf3   : > { %v1562_v63 = vpop.f32.mrf.mxu3 }
 0x102   : > { %v1573_v27 = vpop.f32.mrf.mxu0 }
 0x103   : > { %v1574_v0 = vadd.f32 %v1573_v27, %v1561_v61  ;;  %v1586_v1 = vpop.f32.mrf.mxu1 }
 0x105   : > { %v1587_v3 = vadd.f32 %v1586_v1, %v1574_v0 }
 0x10a   : > { %v1599_v29 = vpop.f32.mrf.mxu2  ;;  %v1575_v7 = vpop.f32.mrf.mxu0 }
 0x10b   : > { %v1600_v4 = vadd.f32 %v1599_v29, %v1587_v3  ;;  %v1612_v5 = vpop.f32.mrf.mxu3  ;;  %v1588_v8 = vpop.f32.mrf.mxu1 }
 0x10d   : > { %v1613_v6 = vadd.f32 %v1612_v5, %v1600_v4 }
 0x10f   : > { %v1772_v9 = vpack.c.bf16 %v1613_v6, %v1535_v54 }
 0x111   : > { %v1776_v50 = vrot.slane %v1772_v9, 3 }
 0x112   : > { %v1601_v10 = vpop.f32.mrf.mxu2 }
 0x113   : > { %v1614_v11 = vpop.f32.mrf.mxu3  ;;  %v1782_v54 = vsel %vm1779_vm0, %v1772_v9, %v1776_v50 }
 0x122   : > { %v1625_v12 = vpop.f32.mrf.mxu0 }
 0x123   : > { %v1638_v13 = vpop.f32.mrf.mxu1  ;;  %v1626_v35 = vadd.f32 %v1625_v12, %v480_v32 }
 0x125   : > { %v1639_v37 = vadd.f32 %v1638_v13, %v1626_v35 }
 0x12a   : > { %v1651_v14 = vpop.f32.mrf.mxu2  ;;  %v1627_v16 = vpop.f32.mrf.mxu0 }
 0x12b   : > { %v1664_v15 = vpop.f32.mrf.mxu3  ;;  %v1640_v17 = vpop.f32.mrf.mxu1  ;;  %v1652_v38 = vadd.f32 %v1651_v14, %v1639_v37 }
 0x12d   : > { %v1665_v25 = vadd.f32 %v1664_v15, %v1652_v38 }
 0x132   : > { %v1653_v18 = vpop.f32.mrf.mxu2 }
 0x133   : > { %v1666_v19 = vpop.f32.mrf.mxu3 }
 0x142   : > { %v1677_v20 = vpop.f32.mrf.mxu0 }
 0x143   : > { %v1690_v21 = vpop.f32.mrf.mxu1  ;;  %v1678_v34 = vadd.f32 %v1677_v20, %v1665_v25 }
 0x145   : > { %v1691_v48 = vadd.f32 %v1690_v21, %v1678_v34 }
 0x14a   : > { %v1703_v22 = vpop.f32.mrf.mxu2  ;;  %v1679_v24 = vpop.f32.mrf.mxu0 }
 0x14b   : > { %v1716_v23 = vpop.f32.mrf.mxu3  ;;  %v1692_v26 = vpop.f32.mrf.mxu1  ;;  %v1704_v28 = vadd.f32 %v1703_v22, %v481_v36 }
 0x14d   : > { %v1717_v39 = vadd.f32 %v1716_v23, %v1704_v28 }
 0x152   : > { %v1705_v31 = vpop.f32.mrf.mxu2 }
 0x153   : > { %v1718_v33 = vpop.f32.mrf.mxu3 }
 0x162   : > { %v1729_v40 = vpop.f32.mrf.mxu0 }
 0x163   : > { %v1742_v41 = vpop.f32.mrf.mxu1  ;;  %v1730_v42 = vadd.f32 %v1729_v40, %v1717_v39 }
 0x165   : > { %v1743_v43 = vadd.f32 %v1742_v41, %v1730_v42 }
 0x16a   : > { %v1755_v44 = vpop.f32.mrf.mxu2  ;;  %v1731_v46 = vpop.f32.mrf.mxu0 }
 0x16b   : > { %v1756_v30 = vadd.f32 %v1755_v44, %v1743_v43  ;;  %v1768_v45 = vpop.f32.mrf.mxu3  ;;  %v1744_v47 = vpop.f32.mrf.mxu1 }
 0x16d   : > { %v1769_v49 = vadd.f32 %v1768_v45, %v1756_v30 }
 0x16f   : > { %v1773_v2 = vpack.c.bf16 %v1769_v49, %v1691_v48 }
 0x171   : > { %v1777_v51 = vrot.slane %v1773_v2, 6  ;;  %v1778_v52 = vrot.slane %v1773_v2, 1 }
 0x172   : > { %v1757_v53 = vpop.f32.mrf.mxu2 }
 0x173   : > { %v1786_v55 = vsel %vm1783_vm1, %v1777_v51, %v1778_v52  ;;  %v1770_v56 = vpop.f32.mrf.mxu3 }
 0x174   : > { %v1788_v57 = vsel %vm1787_vm2, %v1782_v54, %v1786_v55 }
 0x175   : > { %1790 = vst [vmem:[%s282_s18] sm:$0xf] %v1788_v57 }
 0x176 PF: > { %s19_s17 = sadd.s32 1, %s3077_s17   ;;  %s3641_s12 = smov %s3061_s13 }
 0x177   : > { %p16_p0 = scmp.ge.s32.totalorder %s19_s17, 4   ;;  %s3642_s13 = smov %s3065_s14 }
 0x178   : > { %s3643_s14 = smov %s3146_s23  ;;  %s3644_s15 = smov %s3073_s16 }
 0x179   : > { %s3645_s16 = smov %s3647_s19  ;;  %18 = sbr.rel (!%p16_p0) target bundleno = 6 (0x6), region = 88 }
 0x17e   :  { %1818 = vsyncpa [#allocation3], 1 }
 0x17f   :  { %1820 = vsyncpa [#allocation3 + $0x1], 1 }
 0x180   :  { %1821 = vsyncpa [#allocation5], 1 }
 0x181   :  { %1823 = vsyncpa [#allocation5 + $0x1], 1 }

</bundles_post_ra>
